<compile_context>
chip_gen: v7x
topology: tpu7x:2x2x1
jax: 0.10.0
libtpu: 0.0.40
codegen_flags: <defaults>
</compile_context>

<pallas_src>
import functools

import jax
import jax.numpy as jnp
from jax.experimental import pallas as pl
from jax.experimental.pallas import tpu as pltpu

BN_EPS = 1e-5


# ----------------------------------------------------------------------------
# Fused Pallas kernel: conv1 -> BN -> ReLU -> conv2 -> BN -> +x -> ReLU
# Activation layout: (N, H, W*C); lane index = w*C + c (lane-dense for W*C=128).
# ----------------------------------------------------------------------------
def _bn_scale_shift(acc, gamma, beta, rmask, W, n_elems):
    """Training-mode BatchNorm (biased batch stats over N*H*W per channel).

    acc   : (rows, W*C) f32 conv output
    gamma : (1, C) f32,  beta : (1, C) f32
    rmask : (W*C, C) f32 with rmask[w*C+c, c'] = (c == c')  (per-channel reduce)
    Returns lane-broadcast (1, W*C) scale/shift so that  y = acc*scale + shift.
    """
    inv_n = 1.0 / n_elems
    s = jnp.dot(jnp.sum(acc, axis=0, keepdims=True), rmask,
                preferred_element_type=jnp.float32)                 # (1, C)
    ss = jnp.dot(jnp.sum(acc * acc, axis=0, keepdims=True), rmask,
                 preferred_element_type=jnp.float32)                # (1, C)
    mean = s * inv_n
    var = ss * inv_n - mean * mean                                  # E[x^2]-E[x]^2
    scale = gamma * jax.lax.rsqrt(var + BN_EPS)                     # EUP rsqrt
    shift = beta - mean * scale
    # broadcast per-channel (1, C) back to the interleaved (1, W*C) lane layout
    return jnp.tile(scale, (1, W)), jnp.tile(shift, (1, W))


def _resblock_dhp_kernel(x_ref, t1_ref, g1_ref, b1_ref, t2_ref, g2_ref, b2_ref,
                         rmask_ref, o_ref, pad_ref, *,
                         N, H, W, Cin, Cmid, Cout, K):
    """x_ref  : (N, H, W*Cin)  f32
       t1_ref : (K, W*Cin,  W*Cmid) bf16   block-Toeplitz conv1 weights
       t2_ref : (K, W*Cmid, W*Cout) bf16   block-Toeplitz conv2 weights
       g*/b*  : (1, C) f32 BN affine;  rmask_ref : (W*C, C) f32
       o_ref  : (N, H, W*Cout) f32
       pad_ref: (N, H+2p, W*Cin) bf16 scratch; shared H-halo buffer for both
                layers (Cin == Cmid).  W 'SAME' padding is zero blocks baked
                into the Toeplitz weights, so only the H halo is materialized.
    """
    p = K // 2
    NH = N * H
    n_elems = N * H * W
    rmask = rmask_ref[...]

    # -- zero ONLY the halo rows (interior is fully overwritten below) --------
    halo_zeros = jnp.zeros((N, p, W * Cin), jnp.bfloat16)
    pad_ref[:, 0:p, :] = halo_zeros
    pad_ref[:, p + H:p + H + p, :] = halo_zeros

    # -- stage the input (single VMEM load, reused later for the residual) ----
    x_f32 = x_ref[...]
    pad_ref[:, p:p + H, :] = x_f32.astype(jnp.bfloat16)

    # -- layer1: KxK conv as K deep, lane-dense matmuls -----------------------
    acc = jnp.zeros((NH, W * Cmid), jnp.float32)
    for dy in range(K):                                   # K is small; unrolled
        slab = pad_ref[:, dy:dy + H, :].reshape(NH, W * Cin)
        acc = acc + jnp.dot(slab, t1_ref[dy], preferred_element_type=jnp.float32)

    scale1, shift1 = _bn_scale_shift(acc, g1_ref[...], b1_ref[...],
                                     rmask, W, n_elems)
    y1 = jnp.maximum(acc * scale1 + shift1, 0.0)          # BN + ReLU (layer1)

    # -- re-stage layer1 output into the SAME halo buffer (halos still zero) --
    pad_ref[:, p:p + H, :] = y1.reshape(N, H, W * Cmid).astype(jnp.bfloat16)

    # -- layer2: conv -> BN (no activation) -----------------------------------
    acc2 = jnp.zeros((NH, W * Cout), jnp.float32)
    for dy in range(K):
        slab = pad_ref[:, dy:dy + H, :].reshape(NH, W * Cmid)
        acc2 = acc2 + jnp.dot(slab, t2_ref[dy], preferred_element_type=jnp.float32)

    scale2, shift2 = _bn_scale_shift(acc2, g2_ref[...], b2_ref[...],
                                     rmask, W, n_elems)
    y2 = acc2 * scale2 + shift2

    # -- residual add (Cin == Cout) + ReLU, lane-dense store ------------------
    y2 = y2 + x_f32.reshape(NH, W * Cin)
    o_ref[...] = jnp.maximum(y2, 0.0).reshape(N, H, W * Cout)


# ----------------------------------------------------------------------------
# Wrapper-side glue (plain JAX, tiny): hyper-network weight generation and the
# block-Toeplitz fold of the W-direction conv taps (weight-side plumbing only).
# ----------------------------------------------------------------------------
def hyper_conv_weight(z_out, z_in, w1, b1, w2, b2, k):
    """conv_dhp hyper-network: latent -> embedding -> explicit KxK weight (OIHW)."""
    lat = z_out[:, None] * z_in[None, :]                      # (Cout, Cin)
    emb = lat[..., None] * w1 + b1                            # (Cout, Cin, m)
    w = jnp.einsum('oikm,oim->oik', w2, emb) + b2             # (Cout, Cin, k*k)
    return w.reshape(z_out.shape[0], z_in.shape[0], k, k)     # OIHW


def _build_toeplitz(w_hwio, W):
    """Fold the W-direction 'SAME' (stride 1) conv into matmul weights:
       T[dy, wi*Cin+ci, wo*Cout+co] = w[dy, wi-wo+p, ci, co]  (0 outside kernel).
    TODO(synk): for large W / C tile this per Cout block instead of one slab.
    """
    K, _, Cin, Cout = w_hwio.shape
    p = K // 2
    # B[dx, wi, wo] = 1  iff  wi == wo + dx - p
    B = jnp.stack([jnp.eye(W, k=p - dx, dtype=w_hwio.dtype) for dx in range(K)])
    T = jnp.einsum('xab,yxce->yacbe', B, w_hwio)              # (K, W, Cin, W, Cout)
    return T.reshape(K, W * Cin, W * Cout)


# ----------------------------------------------------------------------------
# ResBlock_dhp forward (non-finetuning branch, stride=1, downsample=None)
# ----------------------------------------------------------------------------
def resblock_dhp_forward(x_nchw, latent_input_vector, p):
    k = p['kernel_size']
    N, Cin, H, W = x_nchw.shape

    # hyper-generate conv weights, OIHW -> HWIO
    w1 = hyper_conv_weight(p['l1_latent'], latent_input_vector,
                           p['l1_w1'], p['l1_b1'], p['l1_w2'], p['l1_b2'], k)
    w1 = jnp.transpose(w1, (2, 3, 1, 0))
    w2 = hyper_conv_weight(p['l2_latent'], p['l1_latent'],
                           p['l2_w1'], p['l2_b1'], p['l2_w2'], p['l2_b2'], k)
    w2 = jnp.transpose(w2, (2, 3, 1, 0))
    Cmid, Cout = w1.shape[-1], w2.shape[-1]
    assert Cin == Cout, "stride=1 / no-downsample ResBlock needs in_channels == planes"
    assert Cmid == Cout, "ResBlock_dhp uses expansion=1"

    # block-Toeplitz conv weights, bf16 for the MXU
    t1 = _build_toeplitz(w1, W).astype(jnp.bfloat16)
    t2 = _build_toeplitz(w2, W).astype(jnp.bfloat16)

    # per-channel reduction mask for BN stats: (W*C, C)
    rmask = (jnp.arange(W * Cmid)[:, None] % Cmid ==
             jnp.arange(Cmid)[None, :]).astype(jnp.float32)

    # NCHW -> lane-dense (N, H, W*Cin)
    x_l = jnp.transpose(x_nchw, (0, 2, 3, 1)).reshape(N, H, W * Cin)

    pad = k // 2
    kern = functools.partial(_resblock_dhp_kernel, N=N, H=H, W=W,
                             Cin=Cin, Cmid=Cmid, Cout=Cout, K=k)
    vmem = pl.BlockSpec(memory_space=pltpu.MemorySpace.VMEM)
    out_l = pl.pallas_call(
        kern,
        out_shape=jax.ShapeDtypeStruct((N, H, W * Cout), jnp.float32),
        in_specs=[vmem] * 8,
        out_specs=vmem,
        scratch_shapes=[
            # single shared H-halo buffer (bf16), reused by layer1 and layer2
            pltpu.VMEM((N, H + 2 * pad, W * Cin), jnp.bfloat16),
        ],
        compiler_params=pltpu.CompilerParams(vmem_limit_bytes=32 * 1024 * 1024),
    )(x_l, t1,
      p['l1_gamma'].reshape(1, Cmid), p['l1_beta'].reshape(1, Cmid),
      t2,
      p['l2_gamma'].reshape(1, Cout), p['l2_beta'].reshape(1, Cout),
      rmask)

    out = out_l.reshape(N, H, W, Cout)
    return jnp.transpose(out, (0, 3, 1, 2))                   # NHWC -> NCHW


# ----------------------------------------------------------------------------
# Pure-JAX reference (same bf16 rounding of matmul inputs, f32 accumulation)
# ----------------------------------------------------------------------------
def _ref_conv_bn(x_nhwc, w_hwio, gamma, beta, act, residual=None):
    y = jax.lax.conv_general_dilated(
        x_nhwc.astype(jnp.bfloat16), w_hwio.astype(jnp.bfloat16),
        window_strides=(1, 1), padding='SAME',
        dimension_numbers=('NHWC', 'HWIO', 'NHWC'),
        preferred_element_type=jnp.float32)
    mean = y.mean(axis=(0, 1, 2), keepdims=True)
    var = ((y - mean) ** 2).mean(axis=(0, 1, 2), keepdims=True)
    y = (y - mean) * jax.lax.rsqrt(var + BN_EPS) * gamma + beta
    if residual is not None:
        y = y + residual
    if act:
        y = jnp.maximum(y, 0.0)
    return y


def resblock_dhp_reference(x_nchw, latent_input_vector, p):
    k = p['kernel_size']
    x = jnp.transpose(x_nchw, (0, 2, 3, 1))
    w1 = jnp.transpose(hyper_conv_weight(p['l1_latent'], latent_input_vector,
                                         p['l1_w1'], p['l1_b1'], p['l1_w2'],
                                         p['l1_b2'], k), (2, 3, 1, 0))
    out = _ref_conv_bn(x, w1, p['l1_gamma'], p['l1_beta'], act=True)
    w2 = jnp.transpose(hyper_conv_weight(p['l2_latent'], p['l1_latent'],
                                         p['l2_w1'], p['l2_b1'], p['l2_w2'],
                                         p['l2_b2'], k), (2, 3, 1, 0))
    out = _ref_conv_bn(out, w2, p['l2_gamma'], p['l2_beta'], act=True, residual=x)
    return jnp.transpose(out, (0, 3, 1, 2))


# ----------------------------------------------------------------------------
if __name__ == "__main__":
    # Small shapes consistent with the module: stride=1, downsample=None
    # requires in_channels == planes for the residual add.
    N, Cin, H, W = 2, 8, 16, 16
    planes, K, EMB = 8, 3, 8

    key = jax.random.PRNGKey(0)
    ks = jax.random.split(key, 16)

    def rnd(i, shape, scale=0.1):
        return scale * jax.random.normal(ks[i], shape, jnp.float32)

    x = jax.random.normal(ks[0], (N, Cin, H, W), jnp.float32)
    latent_input_vector = jax.random.normal(ks[1], (Cin,), jnp.float32)

    params = {
        'kernel_size': K,
        # layer1 hyper-params + BN affine
        'l1_latent': jax.random.normal(ks[2], (planes,), jnp.float32),
        'l1_w1': rnd(3, (planes, Cin, EMB)),
        'l1_b1': rnd(4, (planes, Cin, EMB)),
        'l1_w2': rnd(5, (planes, Cin, K * K, EMB)),
        'l1_b2': rnd(6, (planes, Cin, K * K)),
        'l1_gamma': 1.0 + rnd(7, (planes,)),
        'l1_beta': rnd(8, (planes,)),
        # layer2 hyper-params + BN affine
        'l2_latent': jax.random.normal(ks[9], (planes,), jnp.float32),
        'l2_w1': rnd(10, (planes, planes, EMB)),
        'l2_b1': rnd(11, (planes, planes, EMB)),
        'l2_w2': rnd(12, (planes, planes, K * K, EMB)),
        'l2_b2': rnd(13, (planes, planes, K * K)),
        'l2_gamma': 1.0 + rnd(14, (planes,)),
        'l2_beta': rnd(15, (planes,)),
    }

    out = jax.block_until_ready(resblock_dhp_forward(x, latent_input_vector, params))
    ref = jax.block_until_ready(resblock_dhp_reference(x, latent_input_vector, params))

    assert out.shape == (N, planes, H, W) and out.dtype == jnp.float32
    assert jnp.allclose(out, ref, rtol=1e-2, atol=1e-2), \
        "Pallas output mismatch vs reference"

    print("KERNEL_OK")
</pallas_src>

<mosaic_0001>
module attributes {stable_mosaic.version = 11 : i64} {
  func.func @_resblock_dhp_kernel(%arg0: memref<2x16x128xf32, #tpu.memory_space<vmem>>, %arg1: memref<3x128x128xbf16, #tpu.memory_space<vmem>>, %arg2: memref<1x8xf32, #tpu.memory_space<vmem>>, %arg3: memref<1x8xf32, #tpu.memory_space<vmem>>, %arg4: memref<3x128x128xbf16, #tpu.memory_space<vmem>>, %arg5: memref<1x8xf32, #tpu.memory_space<vmem>>, %arg6: memref<1x8xf32, #tpu.memory_space<vmem>>, %arg7: memref<128x8xf32, #tpu.memory_space<vmem>>, %arg8: memref<2x16x128xf32, #tpu.memory_space<vmem>>, %arg9: memref<2x18x128xbf16, #tpu.memory_space<vmem>>) attributes {dimension_semantics = [], scalar_prefetch = 0 : i64, scratch_operands = 1 : i64, tpu.core_type = #tpu.core_type<tc>} {
    %c0 = arith.constant 0 : index
    %c0_0 = arith.constant 0 : index
    %0 = vector.load %arg7[%c0, %c0_0] : memref<128x8xf32, #tpu.memory_space<vmem>>, vector<128x8xf32>
    %cst = arith.constant 0.000000e+00 : bf16
    %1 = vector.broadcast %cst : bf16 to vector<2x1x128xbf16>
    %c0_1 = arith.constant 0 : index
    %c0_2 = arith.constant 0 : index
    %c0_3 = arith.constant 0 : index
    %2 = vector.load %arg9[%c0_1, %c0_2, %c0_3] : memref<2x18x128xbf16, #tpu.memory_space<vmem>>, vector<2x1x128xbf16>
    tpu.vector_store %arg9[%c0_1, %c0_2, %c0_3], %1 {strides = array<i32>} : memref<2x18x128xbf16, #tpu.memory_space<vmem>>, vector<2x1x128xbf16>,
    %c0_4 = arith.constant 0 : index
    %c17 = arith.constant 17 : index
    %c0_5 = arith.constant 0 : index
    %3 = vector.load %arg9[%c0_4, %c17, %c0_5] : memref<2x18x128xbf16, #tpu.memory_space<vmem>>, vector<2x1x128xbf16>
    tpu.vector_store %arg9[%c0_4, %c17, %c0_5], %1 {strides = array<i32>} : memref<2x18x128xbf16, #tpu.memory_space<vmem>>, vector<2x1x128xbf16>,
    %c0_6 = arith.constant 0 : index
    %c0_7 = arith.constant 0 : index
    %c0_8 = arith.constant 0 : index
    %4 = vector.load %arg0[%c0_6, %c0_7, %c0_8] : memref<2x16x128xf32, #tpu.memory_space<vmem>>, vector<2x16x128xf32>
    %5 = arith.truncf %4 : vector<2x16x128xf32> to vector<2x16x128xbf16>
    %c0_9 = arith.constant 0 : index
    %c1 = arith.constant 1 : index
    %c0_10 = arith.constant 0 : index
    %6 = vector.load %arg9[%c0_9, %c1, %c0_10] : memref<2x18x128xbf16, #tpu.memory_space<vmem>>, vector<2x16x128xbf16>
    tpu.vector_store %arg9[%c0_9, %c1, %c0_10], %5 {strides = array<i32>} : memref<2x18x128xbf16, #tpu.memory_space<vmem>>, vector<2x16x128xbf16>,
    %cst_11 = arith.constant 0.000000e+00 : f32
    %7 = vector.broadcast %cst_11 : f32 to vector<32x128xf32>
    %c0_12 = arith.constant 0 : index
    %c0_13 = arith.constant 0 : index
    %c0_14 = arith.constant 0 : index
    %8 = vector.load %arg9[%c0_12, %c0_13, %c0_14] : memref<2x18x128xbf16, #tpu.memory_space<vmem>>, vector<2x16x128xbf16>
    %9 = vector.shape_cast %8 : vector<2x16x128xbf16> to vector<32x128xbf16>
    %c0_15 = arith.constant 0 : index
    %c0_16 = arith.constant 0 : index
    %c0_17 = arith.constant 0 : index
    %10 = vector.load %arg1[%c0_15, %c0_16, %c0_17] : memref<3x128x128xbf16, #tpu.memory_space<vmem>>, vector<1x128x128xbf16>
    %11 = vector.shape_cast %10 : vector<1x128x128xbf16> to vector<128x128xbf16>
    %cst_18 = arith.constant dense<0.000000e+00> : vector<32x128xf32>
    %12 = tpu.matmul %9, %11, %cst_18 {dimension_numbers = #tpu.dot_dimension_numbers<[1], [0], [0], [1], [0, 0, 1, 1], [], []>} : vector<32x128xbf16>, vector<128x128xbf16>, vector<32x128xf32> -> vector<32x128xf32>
    %13 = arith.addf %7, %12 : vector<32x128xf32>
    %c0_19 = arith.constant 0 : index
    %c1_20 = arith.constant 1 : index
    %c0_21 = arith.constant 0 : index
    %14 = vector.load %arg9[%c0_19, %c1_20, %c0_21] : memref<2x18x128xbf16, #tpu.memory_space<vmem>>, vector<2x16x128xbf16>
    %15 = vector.shape_cast %14 : vector<2x16x128xbf16> to vector<32x128xbf16>
    %c1_22 = arith.constant 1 : index
    %c0_23 = arith.constant 0 : index
    %c0_24 = arith.constant 0 : index
    %16 = vector.load %arg1[%c1_22, %c0_23, %c0_24] : memref<3x128x128xbf16, #tpu.memory_space<vmem>>, vector<1x128x128xbf16>
    %17 = vector.shape_cast %16 : vector<1x128x128xbf16> to vector<128x128xbf16>
    %cst_25 = arith.constant dense<0.000000e+00> : vector<32x128xf32>
    %18 = tpu.matmul %15, %17, %cst_25 {dimension_numbers = #tpu.dot_dimension_numbers<[1], [0], [0], [1], [0, 0, 1, 1], [], []>} : vector<32x128xbf16>, vector<128x128xbf16>, vector<32x128xf32> -> vector<32x128xf32>
    %19 = arith.addf %13, %18 : vector<32x128xf32>
    %c0_26 = arith.constant 0 : index
    %c2 = arith.constant 2 : index
    %c0_27 = arith.constant 0 : index
    %20 = vector.load %arg9[%c0_26, %c2, %c0_27] : memref<2x18x128xbf16, #tpu.memory_space<vmem>>, vector<2x16x128xbf16>
    %21 = vector.shape_cast %20 : vector<2x16x128xbf16> to vector<32x128xbf16>
    %c2_28 = arith.constant 2 : index
    %c0_29 = arith.constant 0 : index
    %c0_30 = arith.constant 0 : index
    %22 = vector.load %arg1[%c2_28, %c0_29, %c0_30] : memref<3x128x128xbf16, #tpu.memory_space<vmem>>, vector<1x128x128xbf16>
    %23 = vector.shape_cast %22 : vector<1x128x128xbf16> to vector<128x128xbf16>
    %cst_31 = arith.constant dense<0.000000e+00> : vector<32x128xf32>
    %24 = tpu.matmul %21, %23, %cst_31 {dimension_numbers = #tpu.dot_dimension_numbers<[1], [0], [0], [1], [0, 0, 1, 1], [], []>} : vector<32x128xbf16>, vector<128x128xbf16>, vector<32x128xf32> -> vector<32x128xf32>
    %25 = arith.addf %19, %24 : vector<32x128xf32>
    %c0_32 = arith.constant 0 : index
    %c0_33 = arith.constant 0 : index
    %26 = vector.load %arg2[%c0_32, %c0_33] : memref<1x8xf32, #tpu.memory_space<vmem>>, vector<1x8xf32>
    %c0_34 = arith.constant 0 : index
    %c0_35 = arith.constant 0 : index
    %27 = vector.load %arg3[%c0_34, %c0_35] : memref<1x8xf32, #tpu.memory_space<vmem>>, vector<1x8xf32>
    %cst_36 = arith.constant dense<0.000000e+00> : vector<128xf32>
    %28 = vector.multi_reduction <add>, %25, %cst_36 [0] : vector<32x128xf32> to vector<128xf32>
    %29 = vector.shape_cast %28 : vector<128xf32> to vector<1x128xf32>
    %cst_37 = arith.constant dense<0.000000e+00> : vector<1x8xf32>
    %30 = tpu.matmul %29, %0, %cst_37 {dimension_numbers = #tpu.dot_dimension_numbers<[1], [0], [0], [1], [0, 0, 1, 1], [], []>} : vector<1x128xf32>, vector<128x8xf32>, vector<1x8xf32> -> vector<1x8xf32>
    %31 = arith.mulf %25, %25 : vector<32x128xf32>
    %cst_38 = arith.constant dense<0.000000e+00> : vector<128xf32>
    %32 = vector.multi_reduction <add>, %31, %cst_38 [0] : vector<32x128xf32> to vector<128xf32>
    %33 = vector.shape_cast %32 : vector<128xf32> to vector<1x128xf32>
    %cst_39 = arith.constant dense<0.000000e+00> : vector<1x8xf32>
    %34 = tpu.matmul %33, %0, %cst_39 {dimension_numbers = #tpu.dot_dimension_numbers<[1], [0], [0], [1], [0, 0, 1, 1], [], []>} : vector<1x128xf32>, vector<128x8xf32>, vector<1x8xf32> -> vector<1x8xf32>
    %cst_40 = arith.constant 0.001953125 : f32
    %35 = vector.broadcast %cst_40 : f32 to vector<1x8xf32>
    %36 = arith.mulf %30, %35 : vector<1x8xf32>
    %cst_41 = arith.constant 0.001953125 : f32
    %37 = vector.broadcast %cst_41 : f32 to vector<1x8xf32>
    %38 = arith.mulf %34, %37 : vector<1x8xf32>
    %39 = arith.mulf %36, %36 : vector<1x8xf32>
    %40 = arith.subf %38, %39 : vector<1x8xf32>
    %cst_42 = arith.constant 9.99999974E-6 : f32
    %41 = vector.broadcast %cst_42 : f32 to vector<1x8xf32>
    %42 = arith.addf %40, %41 : vector<1x8xf32>
    %43 = math.rsqrt %42 : vector<1x8xf32>
    %44 = arith.mulf %26, %43 : vector<1x8xf32>
    %45 = arith.mulf %36, %44 : vector<1x8xf32>
    %46 = arith.subf %27, %45 : vector<1x8xf32>
    %47 = tpu.concatenate %44, %44, %44, %44, %44, %44, %44, %44, %44, %44, %44, %44, %44, %44, %44, %44 in 1 : vector<1x8xf32>, vector<1x8xf32>, vector<1x8xf32>, vector<1x8xf32>, vector<1x8xf32>, vector<1x8xf32>, vector<1x8xf32>, vector<1x8xf32>, vector<1x8xf32>, vector<1x8xf32>, vector<1x8xf32>, vector<1x8xf32>, vector<1x8xf32>, vector<1x8xf32>, vector<1x8xf32>, vector<1x8xf32> -> vector<1x128xf32>
    %48 = tpu.concatenate %46, %46, %46, %46, %46, %46, %46, %46, %46, %46, %46, %46, %46, %46, %46, %46 in 1 : vector<1x8xf32>, vector<1x8xf32>, vector<1x8xf32>, vector<1x8xf32>, vector<1x8xf32>, vector<1x8xf32>, vector<1x8xf32>, vector<1x8xf32>, vector<1x8xf32>, vector<1x8xf32>, vector<1x8xf32>, vector<1x8xf32>, vector<1x8xf32>, vector<1x8xf32>, vector<1x8xf32>, vector<1x8xf32> -> vector<1x128xf32>
    %49 = vector.broadcast %47 : vector<1x128xf32> to vector<32x128xf32>
    %50 = arith.mulf %25, %49 : vector<32x128xf32>
    %51 = vector.broadcast %48 : vector<1x128xf32> to vector<32x128xf32>
    %52 = arith.addf %50, %51 : vector<32x128xf32>
    %cst_43 = arith.constant 0.000000e+00 : f32
    %53 = vector.broadcast %cst_43 : f32 to vector<32x128xf32>
    %54 = arith.maximumf %52, %53 : vector<32x128xf32>
    %55 = vector.shape_cast %54 : vector<32x128xf32> to vector<2x16x128xf32>
    %56 = arith.truncf %55 : vector<2x16x128xf32> to vector<2x16x128xbf16>
    %c0_44 = arith.constant 0 : index
    %c1_45 = arith.constant 1 : index
    %c0_46 = arith.constant 0 : index
    %57 = vector.load %arg9[%c0_44, %c1_45, %c0_46] : memref<2x18x128xbf16, #tpu.memory_space<vmem>>, vector<2x16x128xbf16>
    tpu.vector_store %arg9[%c0_44, %c1_45, %c0_46], %56 {strides = array<i32>} : memref<2x18x128xbf16, #tpu.memory_space<vmem>>, vector<2x16x128xbf16>,
    %cst_47 = arith.constant 0.000000e+00 : f32
    %58 = vector.broadcast %cst_47 : f32 to vector<32x128xf32>
    %c0_48 = arith.constant 0 : index
    %c0_49 = arith.constant 0 : index
    %c0_50 = arith.constant 0 : index
    %59 = vector.load %arg9[%c0_48, %c0_49, %c0_50] : memref<2x18x128xbf16, #tpu.memory_space<vmem>>, vector<2x16x128xbf16>
    %60 = vector.shape_cast %59 : vector<2x16x128xbf16> to vector<32x128xbf16>
    %c0_51 = arith.constant 0 : index
    %c0_52 = arith.constant 0 : index
    %c0_53 = arith.constant 0 : index
    %61 = vector.load %arg4[%c0_51, %c0_52, %c0_53] : memref<3x128x128xbf16, #tpu.memory_space<vmem>>, vector<1x128x128xbf16>
    %62 = vector.shape_cast %61 : vector<1x128x128xbf16> to vector<128x128xbf16>
    %cst_54 = arith.constant dense<0.000000e+00> : vector<32x128xf32>
    %63 = tpu.matmul %60, %62, %cst_54 {dimension_numbers = #tpu.dot_dimension_numbers<[1], [0], [0], [1], [0, 0, 1, 1], [], []>} : vector<32x128xbf16>, vector<128x128xbf16>, vector<32x128xf32> -> vector<32x128xf32>
    %64 = arith.addf %58, %63 : vector<32x128xf32>
    %c0_55 = arith.constant 0 : index
    %c1_56 = arith.constant 1 : index
    %c0_57 = arith.constant 0 : index
    %65 = vector.load %arg9[%c0_55, %c1_56, %c0_57] : memref<2x18x128xbf16, #tpu.memory_space<vmem>>, vector<2x16x128xbf16>
    %66 = vector.shape_cast %65 : vector<2x16x128xbf16> to vector<32x128xbf16>
    %c1_58 = arith.constant 1 : index
    %c0_59 = arith.constant 0 : index
    %c0_60 = arith.constant 0 : index
    %67 = vector.load %arg4[%c1_58, %c0_59, %c0_60] : memref<3x128x128xbf16, #tpu.memory_space<vmem>>, vector<1x128x128xbf16>
    %68 = vector.shape_cast %67 : vector<1x128x128xbf16> to vector<128x128xbf16>
    %cst_61 = arith.constant dense<0.000000e+00> : vector<32x128xf32>
    %69 = tpu.matmul %66, %68, %cst_61 {dimension_numbers = #tpu.dot_dimension_numbers<[1], [0], [0], [1], [0, 0, 1, 1], [], []>} : vector<32x128xbf16>, vector<128x128xbf16>, vector<32x128xf32> -> vector<32x128xf32>
    %70 = arith.addf %64, %69 : vector<32x128xf32>
    %c0_62 = arith.constant 0 : index
    %c2_63 = arith.constant 2 : index
    %c0_64 = arith.constant 0 : index
    %71 = vector.load %arg9[%c0_62, %c2_63, %c0_64] : memref<2x18x128xbf16, #tpu.memory_space<vmem>>, vector<2x16x128xbf16>
    %72 = vector.shape_cast %71 : vector<2x16x128xbf16> to vector<32x128xbf16>
    %c2_65 = arith.constant 2 : index
    %c0_66 = arith.constant 0 : index
    %c0_67 = arith.constant 0 : index
    %73 = vector.load %arg4[%c2_65, %c0_66, %c0_67] : memref<3x128x128xbf16, #tpu.memory_space<vmem>>, vector<1x128x128xbf16>
    %74 = vector.shape_cast %73 : vector<1x128x128xbf16> to vector<128x128xbf16>
    %cst_68 = arith.constant dense<0.000000e+00> : vector<32x128xf32>
    %75 = tpu.matmul %72, %74, %cst_68 {dimension_numbers = #tpu.dot_dimension_numbers<[1], [0], [0], [1], [0, 0, 1, 1], [], []>} : vector<32x128xbf16>, vector<128x128xbf16>, vector<32x128xf32> -> vector<32x128xf32>
    %76 = arith.addf %70, %75 : vector<32x128xf32>
    %c0_69 = arith.constant 0 : index
    %c0_70 = arith.constant 0 : index
    %77 = vector.load %arg5[%c0_69, %c0_70] : memref<1x8xf32, #tpu.memory_space<vmem>>, vector<1x8xf32>
    %c0_71 = arith.constant 0 : index
    %c0_72 = arith.constant 0 : index
    %78 = vector.load %arg6[%c0_71, %c0_72] : memref<1x8xf32, #tpu.memory_space<vmem>>, vector<1x8xf32>
    %cst_73 = arith.constant dense<0.000000e+00> : vector<128xf32>
    %79 = vector.multi_reduction <add>, %76, %cst_73 [0] : vector<32x128xf32> to vector<128xf32>
    %80 = vector.shape_cast %79 : vector<128xf32> to vector<1x128xf32>
    %cst_74 = arith.constant dense<0.000000e+00> : vector<1x8xf32>
    %81 = tpu.matmul %80, %0, %cst_74 {dimension_numbers = #tpu.dot_dimension_numbers<[1], [0], [0], [1], [0, 0, 1, 1], [], []>} : vector<1x128xf32>, vector<128x8xf32>, vector<1x8xf32> -> vector<1x8xf32>
    %82 = arith.mulf %76, %76 : vector<32x128xf32>
    %cst_75 = arith.constant dense<0.000000e+00> : vector<128xf32>
    %83 = vector.multi_reduction <add>, %82, %cst_75 [0] : vector<32x128xf32> to vector<128xf32>
    %84 = vector.shape_cast %83 : vector<128xf32> to vector<1x128xf32>
    %cst_76 = arith.constant dense<0.000000e+00> : vector<1x8xf32>
    %85 = tpu.matmul %84, %0, %cst_76 {dimension_numbers = #tpu.dot_dimension_numbers<[1], [0], [0], [1], [0, 0, 1, 1], [], []>} : vector<1x128xf32>, vector<128x8xf32>, vector<1x8xf32> -> vector<1x8xf32>
    %cst_77 = arith.constant 0.001953125 : f32
    %86 = vector.broadcast %cst_77 : f32 to vector<1x8xf32>
    %87 = arith.mulf %81, %86 : vector<1x8xf32>
    %cst_78 = arith.constant 0.001953125 : f32
    %88 = vector.broadcast %cst_78 : f32 to vector<1x8xf32>
    %89 = arith.mulf %85, %88 : vector<1x8xf32>
    %90 = arith.mulf %87, %87 : vector<1x8xf32>
    %91 = arith.subf %89, %90 : vector<1x8xf32>
    %cst_79 = arith.constant 9.99999974E-6 : f32
    %92 = vector.broadcast %cst_79 : f32 to vector<1x8xf32>
    %93 = arith.addf %91, %92 : vector<1x8xf32>
    %94 = math.rsqrt %93 : vector<1x8xf32>
    %95 = arith.mulf %77, %94 : vector<1x8xf32>
    %96 = arith.mulf %87, %95 : vector<1x8xf32>
    %97 = arith.subf %78, %96 : vector<1x8xf32>
    %98 = tpu.concatenate %95, %95, %95, %95, %95, %95, %95, %95, %95, %95, %95, %95, %95, %95, %95, %95 in 1 : vector<1x8xf32>, vector<1x8xf32>, vector<1x8xf32>, vector<1x8xf32>, vector<1x8xf32>, vector<1x8xf32>, vector<1x8xf32>, vector<1x8xf32>, vector<1x8xf32>, vector<1x8xf32>, vector<1x8xf32>, vector<1x8xf32>, vector<1x8xf32>, vector<1x8xf32>, vector<1x8xf32>, vector<1x8xf32> -> vector<1x128xf32>
    %99 = tpu.concatenate %97, %97, %97, %97, %97, %97, %97, %97, %97, %97, %97, %97, %97, %97, %97, %97 in 1 : vector<1x8xf32>, vector<1x8xf32>, vector<1x8xf32>, vector<1x8xf32>, vector<1x8xf32>, vector<1x8xf32>, vector<1x8xf32>, vector<1x8xf32>, vector<1x8xf32>, vector<1x8xf32>, vector<1x8xf32>, vector<1x8xf32>, vector<1x8xf32>, vector<1x8xf32>, vector<1x8xf32>, vector<1x8xf32> -> vector<1x128xf32>
    %100 = vector.broadcast %98 : vector<1x128xf32> to vector<32x128xf32>
    %101 = arith.mulf %76, %100 : vector<32x128xf32>
    %102 = vector.broadcast %99 : vector<1x128xf32> to vector<32x128xf32>
    %103 = arith.addf %101, %102 : vector<32x128xf32>
    %104 = vector.shape_cast %4 : vector<2x16x128xf32> to vector<32x128xf32>
    %105 = arith.addf %103, %104 : vector<32x128xf32>
    %cst_80 = arith.constant 0.000000e+00 : f32
    %106 = vector.broadcast %cst_80 : f32 to vector<32x128xf32>
    %107 = arith.maximumf %105, %106 : vector<32x128xf32>
    %108 = vector.shape_cast %107 : vector<32x128xf32> to vector<2x16x128xf32>
    %c0_81 = arith.constant 0 : index
    %c0_82 = arith.constant 0 : index
    %c0_83 = arith.constant 0 : index
    %109 = vector.load %arg8[%c0_81, %c0_82, %c0_83] : memref<2x16x128xf32, #tpu.memory_space<vmem>>, vector<2x16x128xf32>
    tpu.vector_store %arg8[%c0_81, %c0_82, %c0_83], %108 {strides = array<i32>} : memref<2x16x128xf32, #tpu.memory_space<vmem>>, vector<2x16x128xf32>,
    return
  }
}

</mosaic_0001>

<bundles_post_ra>
// kernel: tpu_custom_call.1
= control target key start
LH: loop header
LB: loop body
LE: loop exit
PB: predicated region body
PF: predicated region fallthrough
CT: control target
= control target key end

     0   :  { %13 = vsyncpa [#allocation4], 0  ;;  %s3179_s0 = inlined_call_operand.vmem [shape: f32[2,16,128], index: 0, kind: input, shape index: {}]   ;;  %s3180_s1 = inlined_call_operand.hbm [shape: bf16[3,128,128], index: 1, kind: input, shape index: {}]   ;;  %s3181_s2 = inlined_call_operand.vmem [shape: f32[1,8], index: 2, kind: input, shape index: {}]   ;;  %s3182_s3 = inlined_call_operand.vmem [shape: f32[1,8], index: 3, kind: input, shape index: {}]   ;;  %s3183_s4 = inlined_call_operand.hbm [shape: bf16[3,128,128], index: 4, kind: input, shape index: {}]   ;;  %s3184_s5 = inlined_call_operand.vmem [shape: f32[1,8], index: 5, kind: input, shape index: {}]   ;;  %s3185_s6 = inlined_call_operand.vmem [shape: f32[1,8], index: 6, kind: input, shape index: {}]   ;;  %s3186_s7 = inlined_call_operand.vmem [shape: f32[128,8], index: 7, kind: input, shape index: {}]   ;;  %s3187_s8 = inlined_call_operand.hbm [shape: f32[2,16,128], index: 8, kind: output, shape index: {}]  }
   0x1   :  { %14 = vsyncpa [#allocation7], 0 }
   0x2   :  { %15 = vsyncpa [#allocation5], 0  ;;  %s2553_s27 = smov [#allocation3]   ;;  %s2481_s9 = scalar_lea.hbm %s3180_s1, 3072 }
   0x3   :  { %s23_s28 = sshll.u32 %s2553_s27, 4  ;;  %p2482_p0 = scmp.ne.s32.totalorder %s3180_s1, %s2481_s9  ;;  %s24_s28 = int_to_ptr.vmem [resolvable:$true] %s23_s28 }
   0x4   :  { %p2485_p1 = scmp.lt.u32.totalorder %s2481_s9, %s3180_s1 }
   0x6   :  { %p2487_p2 = pnand %p2485_p1, %p2482_p0 }
   0x8   :  { %2490 = shalt.err (!%p2487_p2)
}
   0x9   :  { %s2491_s14 = scalar_lea.vmem %s24_s28, 3072  ;;  %p2496_p4 = scmp.lt.s32.totalorder %s24_s28, %s24_s28 }
   0xa   :  { %p2492_p3 = scmp.ne.s32.totalorder %s24_s28, %s2491_s14  ;;  %p2497_p5 = scmp.lt.s32.totalorder %s2491_s14, %s2491_s14 }
   0xc   :  { %p2498_p6 = por %p2497_p5, %p2496_p4 }
   0xe   :  { %p2499_p7 = pnand %p2498_p6, %p2492_p3 }
  0x10   :  { %2502 = shalt.err (!%p2499_p7)
}
  0x11   :  { %s2554_s15 = smov 64   ;;  %s2555_s16 = smov 4  }
  0x12   :  { %29 = dma.hbm_to_vmem [thread:$0]  %s3180_s1, 3072, %s24_s28, [#allocation4], %s2554_s15, %s2554_s15, %s2555_s16  }
  0x13   :  { %s2556_s19 = smov [#allocation6]   ;;  %s2503_s23 = scalar_lea.hbm %s3183_s4, 3072 }
  0x14   :  { %s39_s20 = sshll.u32 %s2556_s19, 4  ;;  %p2504_p8 = scmp.ne.s32.totalorder %s3183_s4, %s2503_s23  ;;  %s40_s20 = int_to_ptr.vmem [resolvable:$true] %s39_s20 }
  0x15   :  { %p2507_p9 = scmp.lt.u32.totalorder %s2503_s23, %s3183_s4 }
  0x17   :  { %p2509_p10 = pnand %p2507_p9, %p2504_p8 }
  0x19   :  { %2512 = shalt.err (!%p2509_p10)
}
  0x1a   :  { %s2513_s29 = scalar_lea.vmem %s40_s20, 3072  ;;  %p2518_p12 = scmp.lt.s32.totalorder %s40_s20, %s40_s20 }
  0x1b   :  { %p2514_p11 = scmp.ne.s32.totalorder %s40_s20, %s2513_s29  ;;  %p2519_p13 = scmp.lt.s32.totalorder %s2513_s29, %s2513_s29 }
  0x1d   :  { %p2520_p0 = por %p2519_p13, %p2518_p12 }
  0x1f   :  { %p2521_p1 = pnand %p2520_p0, %p2514_p11 }
  0x21   :  { %2524 = shalt.err (!%p2521_p1)
}
  0x22   :  { %45 = dma.hbm_to_vmem [thread:$0]  %s3183_s4, 3072, %s40_s20, [#allocation7], %s2554_s15, %s2554_s15, %s2555_s16  }
  0x23   :  { %2547 = dma.done.wait [#allocation4], 3072  }
  0x24   :  { %2548 = vsyncadd [#allocation4], 4294964224 }
  0x25   :  { %2549 = dma.done.wait [#allocation7], 3072  }
  0x26   :  { %2550 = vsyncadd [#allocation7], 4294964224  ;;  %v2557_v0 = vmov 0.0|0.0   ;;  %v2421_v1 = vld [vmem:[#allocation3 + $0x40] sm:$0xff]   ;;  %v2422_v2 = vld [vmem:[#allocation3 + $0x48] sm:$0xff]   ;;  %vm75_vm0 = vcmask 1040384  }
  0x27   :  { %2286 = vmatprep.subr.bf16.mxu1 %v2557_v0  ;;  %2026 = vmatprep.subr.bf16.mxu0 %v2421_v1  ;;  %vm76_vm1 = vsmask.f32 256  ;;  %vm84_vm2 = vsmask.f32 7938  ;;  %v2423_v3 = vld [vmem:[#allocation3 + $0x50] sm:$0xff]   ;;  %v2424_v6 = vld [vmem:[#allocation3 + $0x58] sm:$0xff]  }
  0x28   :  { %2027 = vmatpush3.bf16.msra.mxu0 %v2421_v1  ;;  %vm2651_vm3 = vmand %vm75_vm0, %vm76_vm1  ;;  %vm108_vm5 = vsmask.f32 4368  ;;  %v78_v7 = vld [vmem:[#allocation2] sm:$0x1]  ;;  %v86_v8 = vld [vmem:[#allocation2 + $0x8] sm:$0x1] }
  0x29   :  { %2028 = vmatprep.subr.bf16.mxu0 %v2422_v2  ;;  %vm2656_vm4 = vmand %vm75_vm0, %vm84_vm2  ;;  %v92_v9 = vld [vmem:[%s3179_s0] sm:$0xff]  ;;  %v79_v10 = vsel %vm2651_vm3, 0, %v78_v7  ;;  %v93_v12 = vld [vmem:[%s3179_s0 + $0x8] sm:$0xff]  ;;  %vm150_vm6 = vcmask 1043456   ;;  %vm188_vm9 = vsmask.f32 3328 }
  0x2a   :  { %v87_v11 = vsel %vm2656_vm4, 0, %v86_v8  ;;  %v1890_v13 = vpack.c.bf16 %v92_v9, %v92_v9  ;;  %v2425_v14 = vld [vmem:[#allocation3 + $0x60] sm:$0xff]   ;;  %80 = vst [vmem:[#allocation2] sm:$0x1] %v79_v10  ;;  %v1891_v15 = vpack.c.bf16 %v93_v12, %v93_v12  ;;  %v81_v16 = vld [vmem:[#allocation2 + $0xc] sm:$0x1]  ;;  %vm2682_vm7 = vmor %vm76_vm1, %vm108_vm5 }
  0x2b   :  { %88 = vst [vmem:[#allocation2 + $0x8] sm:$0x1] %v87_v11  ;;  %v89_v17 = vld [vmem:[#allocation2 + $0x14] sm:$0x1]  ;;  %v82_v20 = vsel %vm2651_vm3, 0, %v81_v16  ;;  %v95_v23 = vld [vmem:[%s3179_s0 + $0x18] sm:$0xff]  ;;  %vm2688_vm8 = vmand %vm150_vm6, %vm84_vm2 }
  0x2c   :  { %2029 = vmatpush3.bf16.msra.mxu0 %v2422_v2  ;;  %v111_v18 = vshrl.u32 %v1890_v13, 16  ;;  %v114_v19 = vshll.u32 %v1890_v13, 16  ;;  %v90_v21 = vsel %vm2656_vm4, 0, %v89_v17  ;;  %v94_v22 = vld [vmem:[%s3179_s0 + $0x10] sm:$0xff]  ;;  %v119_v24 = vshrl.u32 %v1891_v15, 16  ;;  %v2426_v38 = vld [vmem:[#allocation3 + $0x68] sm:$0xff]  }
  0x2d   :  { %2030 = vmatprep.subr.bf16.mxu0 %v2423_v3  ;;  %v122_v25 = vshll.u32 %v1891_v15, 16  ;;  %83 = vst [vmem:[#allocation2 + $0xc] sm:$0x1] %v82_v20  ;;  %91 = vst [vmem:[#allocation2 + $0x14] sm:$0x1] %v90_v21  ;;  %v1892_v26 = vpack.c.bf16 %v94_v22, %v94_v22  ;;  %v1893_v27 = vpack.c.bf16 %v95_v23, %v95_v23  ;;  %v2427_v54 = vld [vmem:[#allocation3 + $0x70] sm:$0xff]  }
  0x2e   :  { %v113_v28 = vrot.slane %v111_v18, 7  ;;  %v121_v30 = vrot.slane %v119_v24, 7  ;;  %v2428_v58 = vld [vmem:[#allocation3 + $0x78] sm:$0xff]   ;;  %vm189_vm10 = vsmask.f32 7440  ;;  %v2429_v5 = vld [vmem:[#allocation3] sm:$0xff]  }
  0x2f   :  { %v128_v31 = vshrl.u32 %v1892_v26, 16  ;;  %v131_v32 = vshll.u32 %v1892_v26, 16  ;;  %v136_v33 = vshrl.u32 %v1893_v27, 16  ;;  %v139_v37 = vshll.u32 %v1893_v27, 16  ;;  %vm2728_vm11 = vmor %vm188_vm9, %vm189_vm10  ;;  %s2560_s29 = smov 24   ;;  %s2562_s1 = smov 16  }
  0x30   :  { %2031 = vmatpush3.bf16.msra.mxu0 %v2423_v3  ;;  %v116_v34 = vor.u32 %v114_v19, %v113_v28  ;;  %v117_v35 = vrot.slane %v113_v28, 4  ;;  %v124_v39 = vor.u32 %v122_v25, %v121_v30  ;;  %v126_v40 = vrot.slane %v121_v30, 4  ;;  %s2564_s28 = smov 40   ;;  %s2565_s4 = smov 48   ;;  %v2458_v21 = vld [vmem:[#allocation6 + $0x10] sm:$0xff]  }
  0x31   :  { %2032 = vmatprep.subr.bf16.mxu0 %v2424_v6  ;;  %v130_v41 = vrot.slane %v128_v31, 7  ;;  %v138_v42 = vrot.slane %v136_v33, 7  ;;  %v152_v43 = vld [vmem:[#allocation2] sm:$0xf]  ;;  %vm476_vm12 = vcmask 1042432   ;;  %vm477_vm13 = vcmask 1046532  }
  0x32   :  { %v156_v44 = vld [vmem:[#allocation2 + $0x8] sm:$0x1]  ;;  %v125_v45 = vsel %vm2682_vm7, %v117_v35, %v124_v39  ;;  %v153_v46 = vsel %vm2688_vm8, %v116_v34, %v152_v43  ;;  %v2430_v43 = vld [vmem:[#allocation3 + $0x8] sm:$0xff]   ;;  %vm2774_vm14 = vmor %vm476_vm12, %vm477_vm13  ;;  %vm3188_vm15 = vmmov 0   ;;  %s2566_s30 = smov 56   ;;  %s2567_s9 = smov 72  }
  0x33   :  { %v157_v47 = vsel %vm2651_vm3, %v126_v40, %v156_v44  ;;  %v133_v48 = vor.u32 %v131_v32, %v130_v41  ;;  %154 = vst [vmem:[#allocation2] sm:$0xf] %v153_v46  ;;  %155 = vst [vmem:[#allocation2 + $0x4] sm:$0xf] %v125_v45  ;;  %v134_v49 = vrot.slane %v130_v41, 4  ;;  %v141_v50 = vor.u32 %v139_v37, %v138_v42  ;;  %v59_v37 = vld [vmem:[%s3186_s7] sm:$0xff] }
  0x34   :  { %2033 = vmatpush3.bf16.msra.mxu0 %v2424_v6  ;;  %158 = vst [vmem:[#allocation2 + $0x8] sm:$0x1] %v157_v47  ;;  %v143_v51 = vrot.slane %v138_v42, 4  ;;  %v159_v52 = vld [vmem:[#allocation2 + $0xc] sm:$0xf]  ;;  %v61_v40 = vld [vmem:[%s3186_s7 + $0x10] sm:$0xff] }
  0x35   :  { %2034 = vmatprep.subr.bf16.mxu0 %v2425_v14  ;;  %v163_v53 = vld [vmem:[#allocation2 + $0x14] sm:$0x1]  ;;  %v160_v55 = vsel %vm2688_vm8, %v133_v48, %v159_v52  ;;  %v142_v56 = vsel %vm2682_vm7, %v134_v49, %v141_v50  ;;  %v62_v41 = vld [vmem:[%s3186_s7 + $0x18] sm:$0xff]  ;;  %v63_v47 = vld [vmem:[%s3186_s7 + $0x20] sm:$0xff]  ;;  %s2568_s10 = smov 80   ;;  %s2569_s11 = smov 88  }
  0x36   :  { %161 = vst [vmem:[#allocation2 + $0xc] sm:$0xf] %v160_v55  ;;  %v164_v57 = vsel %vm2651_vm3, %v143_v51, %v163_v53  ;;  %162 = vst [vmem:[#allocation2 + $0x10] sm:$0xf] %v142_v56  ;;  %v64_v48 = vld [vmem:[%s3186_s7 + $0x28] sm:$0xff]  ;;  %v2763_v50 = vpack.c.bf16 %v62_v41, %v61_v40  ;;  %v2432_v53 = vld [vmem:[#allocation3 + $0x18] sm:$0xff]  }
  0x37   :  { %165 = vst [vmem:[#allocation2 + $0x14] sm:$0x1] %v164_v57  ;;  %v2431_v51 = vld [vmem:[#allocation3 + $0x10] sm:$0xff]   ;;  %v2767_v52 = vpack.c.bf16 %v64_v48, %v63_v47  ;;  %v2434_v55 = vld [vmem:[#allocation3 + $0x28] sm:$0xff]   ;;  %v2559_v40 = vmov 0.0   ;;  %s2570_s12 = smov 96  }
  0x38   :  { %2035 = vmatpush3.bf16.msra.mxu0 %v2425_v14  ;;  %v2435_v56 = vld [vmem:[#allocation3 + $0x30] sm:$0xff]   ;;  %2118 = vmatprep.mubr.msk.f32.mxu1 %vm3188_vm15, %v2559_v40  ;;  %s2571_s13 = smov 104   ;;  %s2572_s14 = smov 112   ;;  %vm3189_vm0 = vcmask 64512   ;;  %vm3191_vm1 = vcmask 130048   ;;  %vm3192_vm2 = vcmask 195584  }
  0x39   :  { %2036 = vmatprep.subr.bf16.mxu0 %v2426_v38  ;;  %s2573_s16 = smov 120   ;;  %vm3193_vm4 = vcmask 261120   ;;  %vm850_vm5 = vcmask 326656   ;;  %vm3190_vm6 = vcmask 392192   ;;  %vm854_vm9 = vcmask 457728  }
  0x3a   :  { %v2704_v59 = vld [vmem:[#allocation2] sm:$0xf]  ;;  %v2706_v60 = vld [vmem:[#allocation2 + $0x4] sm:$0xf]  ;;  %vm856_vm10 = vcmask 523264   ;;  %vm858_vm12 = vcmask 588800  }
  0x3b   :  { %v2708_v61 = vld [vmem:[#allocation2 + $0x8] sm:$0x1]  ;;  %v192_v62 = vshrl.u32 %v2704_v59, 16  ;;  %v195_v63 = vshll.u32 %v2704_v59, 16  ;;  %v201_v1 = vshll.u32 %v2706_v60, 16  ;;  %v205_v2 = vshrl.u32 %v2706_v60, 16 }
  0x3c   :  { %2037 = vmatpush3.bf16.msra.mxu0 %v2426_v38  ;;  %v211_v3 = vshll.u32 %v2708_v61, 16  ;;  %v60_v38 = vld [vmem:[%s3186_s7 + $0x8] sm:$0xff]  ;;  %v1832_v46 = vcombine.low %v2704_v59, %v2706_v60  ;;  %v481_v57 = vrot.slane %v2706_v60, 5  ;;  %vm860_vm13 = vcmask 654336  }
  0x3d   :  { %2038 = vmatprep.subr.bf16.mxu0 %v2427_v54  ;;  %v2715_v6 = vld [vmem:[#allocation2 + $0xc] sm:$0xf]  ;;  %v194_v7 = vrot.slane %v192_v62, 4  ;;  %v197_v8 = vrot.slane %v195_v63, 5  ;;  %v203_v9 = vrot.slane %v201_v1, 5  ;;  %v207_v10 = vrot.slane %v205_v2, 4 }
  0x3e   :  { %v2717_v11 = vld [vmem:[#allocation2 + $0x10] sm:$0xf]  ;;  %v213_v12 = vrot.slane %v211_v3, 5  ;;  %v2719_v13 = vld [vmem:[#allocation2 + $0x14] sm:$0x1]  ;;  %v216_v14 = vshrl.u32 %v2715_v6, 16  ;;  %v2750_v44 = vpack.c.bf16 %v60_v38, %v59_v37 }
  0x3f   :  { %v219_v15 = vshll.u32 %v2715_v6, 16  ;;  %v225_v16 = vshll.u32 %v2717_v11, 16  ;;  %v198_v17 = vor.u32 %v197_v8, %v194_v7  ;;  %v208_v18 = vor.u32 %v207_v10, %v203_v9  ;;  %v2436_v62 = vld [vmem:[#allocation3 + $0x38] sm:$0xff]   ;;  %v2441_v10 = vld [vmem:[#allocation3 + $0x90] sm:$0xff]  }
  0x40   :  { %2039 = vmatpush3.bf16.msra.mxu0 %v2427_v54  ;;  %v229_v19 = vshrl.u32 %v2717_v11, 16  ;;  %v235_v20 = vshll.u32 %v2719_v13, 16  ;;  %v218_v22 = vrot.slane %v216_v14, 4  ;;  %2288 = vmatpush3.bf16.msra.mxu1 %v2750_v44  ;;  %v2433_v54 = vld [vmem:[#allocation3 + $0x20] sm:$0xff]   ;;  %v483_v1 = vrot.slane %v481_v57, 4  ;;  %v73_v38 = vld [vmem:[%s3186_s7 + $0x70] sm:$0xff] }
  0x41   :  { %2040 = vmatprep.subr.bf16.mxu0 %v2428_v58  ;;  %v221_v23 = vrot.slane %v219_v15, 5  ;;  %v227_v24 = vrot.slane %v225_v16, 5  ;;  %v199_v25 = vrot.slane %v198_v17, 4  ;;  %v209_v26 = vrot.slane %v208_v18, 4  ;;  %2289 = vmatprep.subr.bf16.mxu1 %v2557_v0  ;;  %v2443_v14 = vld [vmem:[#allocation3 + $0xa0] sm:$0xff]   ;;  %v2444_v15 = vld [vmem:[#allocation3 + $0xa8] sm:$0xff]  }
  0x42   :  { %v231_v27 = vrot.slane %v229_v19, 4  ;;  %v237_v33 = vrot.slane %v235_v20, 5  ;;  %v484_v2 = vrot.slane %v2708_v61, 5  ;;  %v1833_v8 = vcombine.low %v2715_v6, %v2717_v11  ;;  %v2440_v61 = vld [vmem:[#allocation3 + $0x88] sm:$0xff]   ;;  %v2445_v16 = vld [vmem:[#allocation3 + $0xb0] sm:$0xff]  }
  0x43   :  { %v222_v28 = vor.u32 %v221_v23, %v218_v22  ;;  %v204_v30 = vsel %vm2728_vm11, %v199_v25, %v203_v9  ;;  %v214_v31 = vsel %vm2728_vm11, %v209_v26, %v213_v12  ;;  %v2442_v12 = vld [vmem:[#allocation3 + $0x98] sm:$0xff]   ;;  %v488_v6 = vrot.slane %v2717_v11, 5  ;;  %v471_v17 = vld [vmem:[#allocation2 + $0xc] sm:$0xe] }
  0x44   :  { %2041 = vmatpush3.bf16.msra.mxu0 %v2428_v58  ;;  %v232_v32 = vor.u32 %v231_v27, %v227_v24  ;;  %v1822_v34 = vcombine.low %v204_v30, %v214_v31  ;;  %2291 = vmatpush3.bf16.msra.mxu1 %v2763_v50  ;;  %v470_v58 = vld [vmem:[#allocation2] sm:$0xe]  ;;  %v485_v7 = vsel %vm2774_vm14, %v483_v1, %v484_v2  ;;  %v1843_v18 = vrot.slane %v471_v17, 9  ;;  %v2446_v22 = vld [vmem:[#allocation3 + $0xb8] sm:$0xff]   ;;  %v2471_v3 = vld [vmem:[#allocation6 + $0xb0] sm:$0xff]  }
  0x45   :  { %2046 = vmatprep.subr.bf16.mxu0 %v2429_v5  ;;  %v223_v35 = vrot.slane %v222_v28, 4  ;;  %2292 = vmatprep.subr.bf16.mxu1 %v2557_v0  ;;  %v1842_v63 = vrot.slane %v470_v58, 9  ;;  %v490_v19 = vrot.slane %v488_v6, 4  ;;  %v491_v20 = vrot.slane %v2719_v13, 5  ;;  %v65_v11 = vld [vmem:[%s3186_s7 + $0x30] sm:$0xff]  ;;  %v66_v13 = vld [vmem:[%s3186_s7 + $0x38] sm:$0xff] }
  0x46   :  { %v233_v39 = vrot.slane %v232_v32, 4  ;;  %2042 = vmatprep.mubr.bf16.mxu0 %v1822_v34  ;;  %v489_v23 = vsel %vm2774_vm14, %v1843_v18, %v488_v6  ;;  %v2803_v26 = vpack.c.bf16 %v66_v13, %v65_v11  ;;  %v67_v27 = vld [vmem:[%s3186_s7 + $0x40] sm:$0xff]  ;;  %v68_v28 = vld [vmem:[%s3186_s7 + $0x48] sm:$0xff]  ;;  %v69_v31 = vld [vmem:[%s3186_s7 + $0x50] sm:$0xff] }
  0x47   :  { %v228_v42 = vsel %vm2728_vm11, %v223_v35, %v227_v24  ;;  %v482_v60 = vsel %vm2774_vm14, %v1842_v63, %v481_v57  ;;  %v492_v24 = vsel %vm2774_vm14, %v490_v19, %v491_v20  ;;  %v2815_v30 = vpack.c.bf16 %v68_v28, %v67_v27  ;;  %v70_v32 = vld [vmem:[%s3186_s7 + $0x58] sm:$0xff]  ;;  %v71_v34 = vld [vmem:[%s3186_s7 + $0x60] sm:$0xff]  ;;  %v72_v35 = vld [vmem:[%s3186_s7 + $0x68] sm:$0xff] }
  0x48   :  { %v238_v45 = vsel %vm2728_vm11, %v233_v39, %v237_v33  ;;  %2294 = vmatpush3.bf16.msra.mxu1 %v2767_v52  ;;  %v1844_v9 = vcombine.low %v482_v60, %v485_v7  ;;  %v1845_v25 = vcombine.low %v489_v23, %v492_v24  ;;  %v2827_v33 = vpack.c.bf16 %v70_v32, %v69_v31  ;;  %v74_v39 = vld [vmem:[%s3186_s7 + $0x78] sm:$0xff]  ;;  %v620_v28 = vld [vmem:[%s3182_s3] sm:$0x1]  ;;  %s2563_s3 = smov 32  }
  0x49   :  { %v1823_v49 = vcombine.low %v228_v42, %v238_v45  ;;  %2295 = vmatprep.subr.bf16.mxu1 %v2557_v0  ;;  %v2839_v37 = vpack.c.bf16 %v72_v35, %v71_v34  ;;  %v2852_v41 = vpack.c.bf16 %v74_v39, %v73_v38  ;;  %v793_v23 = vlaneseq  ;;  %v2447_v38 = vld [vmem:[#allocation6 + $0x40] sm:$0xff]   ;;  %v2448_v39 = vld [vmem:[#allocation6 + $0x48] sm:$0xff]  }
  0x4b   :  { %2043 = vmatmul.mubr.bf16.vlgmr.msra.gmra.mrb[0].mxu0 %v1823_v49  ;;  %v794_v24 = vshrl.u32 %v793_v23, 7 }
  0x4c   :  { %2047 = vmatpush3.bf16.msra.mxu0 %v2429_v5  ;;  %2062 = vmatprep.mubr.bf16.mxu0 %v1832_v46  ;;  %v2438_v5 = vld [vmem:[#allocation3 + $0x80] sm:$0xff]  }
  0x4d   :  { %2048 = vmatprep.subr.bf16.mxu0 %v2430_v43  ;;  %2297 = vmatpush3.bf16.msra.mxu1 %v2803_v26  ;;  %v2901_v11 = vsub.s32 0, %v794_v24 }
  0x4e   :  { %2298 = vmatprep.subr.bf16.mxu1 %v2557_v0 }
  0x50   :  { %2049 = vmatpush3.bf16.msra.mxu0 %v2430_v43 }
  0x51   :  { %2050 = vmatprep.subr.bf16.mxu0 %v2431_v51  ;;  %2300 = vmatpush3.bf16.msra.mxu1 %v2815_v30 }
  0x52   :  { %2301 = vmatprep.subr.bf16.mxu1 %v2557_v0 }
  0x54   :  { %2051 = vmatpush3.bf16.msra.mxu0 %v2431_v51 }
  0x55   :  { %2052 = vmatprep.subr.bf16.mxu0 %v2432_v53  ;;  %2303 = vmatpush3.bf16.msra.mxu1 %v2827_v33 }
  0x56   :  { %2304 = vmatprep.subr.bf16.mxu1 %v2557_v0 }
  0x58   :  { %2053 = vmatpush3.bf16.msra.mxu0 %v2432_v53 }
  0x59   :  { %2054 = vmatprep.subr.bf16.mxu0 %v2433_v54  ;;  %2306 = vmatpush3.bf16.msra.mxu1 %v2839_v37 }
  0x5a   :  { %2307 = vmatprep.subr.bf16.mxu1 %v2557_v0 }
  0x5c   :  { %2055 = vmatpush3.bf16.msra.mxu0 %v2433_v54 }
  0x5d   :  { %2056 = vmatprep.subr.bf16.mxu0 %v2434_v55  ;;  %2309 = vmatpush3.bf16.msra.mxu1 %v2852_v41 }
  0x5e   :  { %2310 = vmatprep.subr.bf16.mxu1 %v2557_v0 }
  0x60   :  { %2057 = vmatpush3.bf16.msra.mxu0 %v2434_v55 }
  0x61   :  { %2058 = vmatprep.subr.bf16.mxu0 %v2435_v56 }
  0x64   :  { %2059 = vmatpush3.bf16.msra.mxu0 %v2435_v56 }
  0x65   :  { %2060 = vmatprep.subr.bf16.mxu0 %v2436_v62 }
  0x68   :  { %2061 = vmatpush3.bf16.msra.mxu0 %v2436_v62 }
  0x69   :  { %2066 = vmatprep.subr.bf16.mxu0 %v2438_v5 }
  0x6b   :  { %2063 = vmatmul.mubr.bf16.vlgmr.msra.gmra.mrb[0].mxu0 %v1833_v8 }
  0x6c   :  { %2067 = vmatpush3.bf16.msra.mxu0 %v2438_v5  ;;  %2082 = vmatprep.mubr.bf16.mxu0 %v1844_v9 }
  0x6d   :  { %2068 = vmatprep.subr.bf16.mxu0 %v2440_v61 }
  0x70   :  { %2069 = vmatpush3.bf16.msra.mxu0 %v2440_v61 }
  0x71   :  { %2070 = vmatprep.subr.bf16.mxu0 %v2441_v10 }
  0x74   :  { %2071 = vmatpush3.bf16.msra.mxu0 %v2441_v10 }
  0x75   :  { %2072 = vmatprep.subr.bf16.mxu0 %v2442_v12 }
  0x78   :  { %2073 = vmatpush3.bf16.msra.mxu0 %v2442_v12 }
  0x79   :  { %2074 = vmatprep.subr.bf16.mxu0 %v2443_v14 }
  0x7c   :  { %2075 = vmatpush3.bf16.msra.mxu0 %v2443_v14 }
  0x7d   :  { %2076 = vmatprep.subr.bf16.mxu0 %v2444_v15 }
  0x80   :  { %2077 = vmatpush3.bf16.msra.mxu0 %v2444_v15 }
  0x81   :  { %2078 = vmatprep.subr.bf16.mxu0 %v2445_v16 }
  0x84   :  { %2079 = vmatpush3.bf16.msra.mxu0 %v2445_v16 }
  0x85   :  { %2080 = vmatprep.subr.bf16.mxu0 %v2446_v22 }
  0x88   :  { %2081 = vmatpush3.bf16.msra.mxu0 %v2446_v22 }
  0x89   :  { %2334 = vmatprep.subr.bf16.mxu0 %v2557_v0 }
  0x8b   :  { %2083 = vmatmul.mubr.bf16.vlgmr.msra.gmra.mrb[0].mxu0 %v1845_v25  ;;  %v619_v25 = vld [vmem:[%s3181_s2] sm:$0x1]  ;;  %s2561_s2 = smov 8  }
  0x8c   :  { %2336 = vmatpush3.bf16.msra.mxu0 %v2750_v44  ;;  %2248 = vmatprep.mubr.msk.f32.mxu0 %vm3188_vm15, %v2559_v40 }
  0x8d   :  { %2337 = vmatprep.subr.bf16.mxu0 %v2557_v0 }
  0x90   :  { %2339 = vmatpush3.bf16.msra.mxu0 %v2763_v50 }
  0x91   :  { %2340 = vmatprep.subr.bf16.mxu0 %v2557_v0 }
  0x94   :  { %2342 = vmatpush3.bf16.msra.mxu0 %v2767_v52 }
  0x95   :  { %2343 = vmatprep.subr.bf16.mxu0 %v2557_v0 }
  0x98   :  { %2345 = vmatpush3.bf16.msra.mxu0 %v2803_v26 }
  0x99   :  { %2346 = vmatprep.subr.bf16.mxu0 %v2557_v0 }
  0x9c   :  { %2348 = vmatpush3.bf16.msra.mxu0 %v2815_v30 }
  0x9d   :  { %2349 = vmatprep.subr.bf16.mxu0 %v2557_v0 }
  0xa0   :  { %2351 = vmatpush3.bf16.msra.mxu0 %v2827_v33 }
  0xa1   :  { %2352 = vmatprep.subr.bf16.mxu0 %v2557_v0 }
  0xa4   :  { %2354 = vmatpush3.bf16.msra.mxu0 %v2839_v37 }
  0xa5   :  { %2355 = vmatprep.subr.bf16.mxu0 %v2557_v0 }
  0xa8   :  { %2357 = vmatpush3.bf16.msra.mxu0 %v2852_v41 }
  0xa9   :  { %2358 = vmatprep.subr.bf16.mxu0 %v2557_v0 }
 0x15e   :  { %v2861_v42 = vpop.f32.mrb[0].mxu0 }
 0x15f   :  { %v2863_v43 = vpop.f32.mrb[1].mxu0  ;;  %v702_v51 = vmul.f32 %v2861_v42, %v2861_v42 }
 0x160   :  { %v2865_v45 = vpop.f32.mrb[2].mxu0  ;;  %v700_v47 = vmul.f32 %v2863_v43, %v2863_v43 }
 0x161   :  { %v2867_v46 = vpop.f32.mrb[3].mxu0  ;;  %v703_v55 = vmul.f32 %v2865_v45, %v2865_v45 }
 0x162   :  { %v621_v48 = vadd.f32 %v2867_v46, %v2863_v43  ;;  %v701_v49 = vmul.f32 %v2867_v46, %v2867_v46 }
 0x164   :  { %v622_v53 = vadd.f32 %v2861_v42, %v621_v48  ;;  %v704_v54 = vadd.f32 %v701_v49, %v700_v47  ;;  %v2449_v47 = vld [vmem:[#allocation6 + $0x50] sm:$0xff]   ;;  %v2450_v48 = vld [vmem:[#allocation6 + $0x58] sm:$0xff]   ;;  %v2451_v49 = vld [vmem:[#allocation6 + $0x60] sm:$0xff]  }
 0x166   :  { %v623_v56 = vadd.f32 %v2865_v45, %v622_v53  ;;  %v705_v57 = vadd.f32 %v704_v54, %v702_v51  ;;  %v2452_v51 = vld [vmem:[#allocation6 + $0x68] sm:$0xff]   ;;  %v2453_v53 = vld [vmem:[#allocation6 + $0x70] sm:$0xff]   ;;  %v2454_v54 = vld [vmem:[#allocation6 + $0x78] sm:$0xff]  }
 0x168   :  { %v624_v58 = vrot.slane %v623_v56, 4  ;;  %v706_v62 = vadd.f32 %v705_v57, %v703_v55  ;;  %v2945_v55 = vld [vmem:[#allocation6] sm:$0xff]  }
 0x16a   :  { %v625_v63 = vadd.f32 %v624_v58, %v623_v56  ;;  %v707_v7 = vrot.slane %v706_v62, 4 }
 0x16c   :  { %v626_v1 = vrot.slane %v625_v63, 2  ;;  %v708_v8 = vadd.f32 %v707_v7, %v706_v62 }
 0x16e   :  { %v627_v2 = vadd.f32 %v626_v1, %v625_v63  ;;  %v709_v9 = vrot.slane %v708_v8, 2 }
 0x170   :  { %v628_v5 = vrot.slane %v627_v2, 1  ;;  %v710_v61 = vadd.f32 %v709_v9, %v708_v8 }
 0x172   :  { %v629_v60 = vadd.f32 %v628_v5, %v627_v2  ;;  %v711_v10 = vrot.slane %v710_v61, 1 }
 0x174   :  { %2119 = vmatmul.mubr.f32.vlgmr.msra.gmra.mrb[0].mxu1 %v629_v60  ;;  %v712_v12 = vadd.f32 %v711_v10, %v710_v61 }
 0x175   :  { %2312 = vmatpush3.bf16.msra.mxu1 %v2750_v44  ;;  %2153 = vmatprep.mubr.msk.f32.mxu1 %vm3188_vm15, %v2559_v40  ;;  %vm862_vm15 = vcmask 719872  }
 0x176   :  { %2313 = vmatprep.subr.bf16.mxu1 %v2557_v0 }
 0x179   :  { %2315 = vmatpush3.bf16.msra.mxu1 %v2763_v50 }
 0x17a   :  { %2316 = vmatprep.subr.bf16.mxu1 %v2557_v0 }
 0x17d   :  { %2318 = vmatpush3.bf16.msra.mxu1 %v2767_v52 }
 0x17e   :  { %2319 = vmatprep.subr.bf16.mxu1 %v2557_v0 }
 0x181   :  { %2321 = vmatpush3.bf16.msra.mxu1 %v2803_v26 }
 0x182   :  { %2322 = vmatprep.subr.bf16.mxu1 %v2557_v0 }
 0x185   :  { %2324 = vmatpush3.bf16.msra.mxu1 %v2815_v30 }
 0x186   :  { %2325 = vmatprep.subr.bf16.mxu1 %v2557_v0 }
 0x189   :  { %2327 = vmatpush3.bf16.msra.mxu1 %v2827_v33 }
 0x18a   :  { %2328 = vmatprep.subr.bf16.mxu1 %v2557_v0 }
 0x18d   :  { %2330 = vmatpush3.bf16.msra.mxu1 %v2839_v37 }
 0x18e   :  { %2331 = vmatprep.subr.bf16.mxu1 %v2557_v0 }
 0x191   :  { %2333 = vmatpush3.bf16.msra.mxu1 %v2852_v41 }
 0x192   :  { %2156 = vmatprep.subr.bf16.mxu1 %v2447_v38 }
 0x194   :  { %2154 = vmatmul.mubr.f32.vlgmr.msra.gmra.mrb[2].mxu1 %v712_v12 }
 0x195   :  { %2157 = vmatpush3.bf16.msra.mxu1 %v2447_v38 }
 0x196   :  { %2158 = vmatprep.subr.bf16.mxu1 %v2448_v39 }
 0x199   :  { %2159 = vmatpush3.bf16.msra.mxu1 %v2448_v39 }
 0x19a   :  { %2160 = vmatprep.subr.bf16.mxu1 %v2449_v47 }
 0x19d   :  { %2161 = vmatpush3.bf16.msra.mxu1 %v2449_v47 }
 0x19e   :  { %2162 = vmatprep.subr.bf16.mxu1 %v2450_v48 }
 0x1a1   :  { %2163 = vmatpush3.bf16.msra.mxu1 %v2450_v48 }
 0x1a2   :  { %2164 = vmatprep.subr.bf16.mxu1 %v2451_v49 }
 0x1a5   :  { %2165 = vmatpush3.bf16.msra.mxu1 %v2451_v49 }
 0x1a6   :  { %2166 = vmatprep.subr.bf16.mxu1 %v2452_v51 }
 0x1a9   :  { %2167 = vmatpush3.bf16.msra.mxu1 %v2452_v51 }
 0x1aa   :  { %2168 = vmatprep.subr.bf16.mxu1 %v2453_v53 }
 0x1ad   :  { %2169 = vmatpush3.bf16.msra.mxu1 %v2453_v53 }
 0x1ae   :  { %2170 = vmatprep.subr.bf16.mxu1 %v2454_v54 }
 0x1b1   :  { %2171 = vmatpush3.bf16.msra.mxu1 %v2454_v54 }
 0x1b2   :  { %2176 = vmatprep.subr.bf16.mxu1 %v2945_v55 }
 0x247   :  { %v696_v14 = vpop.f32.mrb[0].mxu1 }
 0x248   :  { %v2120_v15 = vpop.f32.mrb[1].mxu1  ;;  %v783_v6 = vmul.f32 0.001953125, %v696_v14 }
 0x24a   :  { %v785_v17 = vmul.f32 %v783_v6, %v783_v6 }
 0x267   :  { %v779_v16 = vpop.f32.mrb[2].mxu1 }
 0x268   :  { %v784_v18 = vmul.f32 0.001953125, %v779_v16  ;;  %v2155_v19 = vpop.f32.mrb[3].mxu1 }
 0x26a   :  { %v786_v20 = vsub.f32 %v784_v18, %v785_v17 }
 0x26c   :  { %v787_v22 = vadd.f32 1e-05, %v786_v20 }
 0x26e   :  { %2473 = vrsqrt.f32 %v787_v22 }
 0x278   :  { %v2474_v13 = vpop.eup %2473 }
 0x279   :  { %v2903_v27 = vmul.f32 %v2474_v13, %v619_v25 }
 0x27b   :  { %v790_v31 = vmul.f32 %v2903_v27, %v783_v6  ;;  %v796_v32 = vrot.slane %v2903_v27, %v2901_v11 }
 0x27d   :  { %v2911_v34 = vsub.f32 %v620_v28, %v790_v31  ;;  %803 = vrot.lane.b32.xlu1 %v796_v32, %s2560_s29  ;;  %797 = vrot.lane.b32.xlu0 %v796_v32, %s2561_s2 }
 0x27f   :  { %v876_v35 = vrot.slane %v2911_v34, %v2901_v11 }
 0x281   :  { %800 = vrot.lane.b32.xlu0 %v796_v32, %s2562_s1  ;;  %877 = vrot.lane.b32.xlu1 %v876_v35, %s2561_s2 }
 0x285   :  { %806 = vrot.lane.b32.xlu0 %v796_v32, %s2563_s3  ;;  %880 = vrot.lane.b32.xlu1 %v876_v35, %s2562_s1 }
 0x289   :  { %809 = vrot.lane.b32.xlu0 %v796_v32, %s2564_s28  ;;  %883 = vrot.lane.b32.xlu1 %v876_v35, %s2560_s29 }
 0x28d   :  { %812 = vrot.lane.b32.xlu0 %v796_v32, %s2565_s4  ;;  %886 = vrot.lane.b32.xlu1 %v876_v35, %s2563_s3 }
 0x291   :  { %815 = vrot.lane.b32.xlu0 %v796_v32, %s2566_s30  ;;  %889 = vrot.lane.b32.xlu1 %v876_v35, %s2564_s28 }
 0x295   :  { %818 = vrot.lane.b32.xlu0 %v796_v32, %s2554_s15  ;;  %892 = vrot.lane.b32.xlu1 %v876_v35, %s2565_s4 }
 0x299   :  { %821 = vrot.lane.b32.xlu0 %v796_v32, %s2567_s9  ;;  %895 = vrot.lane.b32.xlu1 %v876_v35, %s2566_s30 }
 0x29d   :  { %824 = vrot.lane.b32.xlu0 %v796_v32, %s2568_s10  ;;  %898 = vrot.lane.b32.xlu1 %v876_v35, %s2554_s15 }
 0x2a1   :  { %827 = vrot.lane.b32.xlu0 %v796_v32, %s2569_s11  ;;  %901 = vrot.lane.b32.xlu1 %v876_v35, %s2567_s9 }
 0x2a5   :  { %830 = vrot.lane.b32.xlu0 %v796_v32, %s2570_s12  ;;  %904 = vrot.lane.b32.xlu1 %v876_v35, %s2568_s10 }
 0x2a9   :  { %833 = vrot.lane.b32.xlu0 %v796_v32, %s2571_s13  ;;  %907 = vrot.lane.b32.xlu1 %v876_v35, %s2569_s11 }
 0x2ad   :  { %836 = vrot.lane.b32.xlu0 %v796_v32, %s2572_s14  ;;  %910 = vrot.lane.b32.xlu1 %v876_v35, %s2570_s12 }
 0x2b1   :  { %839 = vrot.lane.b32.xlu0 %v796_v32, %s2573_s16  ;;  %913 = vrot.lane.b32.xlu1 %v876_v35, %s2571_s13 }
 0x2b5   :  { %916 = vrot.lane.b32.xlu0 %v876_v35, %s2572_s14  ;;  %919 = vrot.lane.b32.xlu1 %v876_v35, %s2573_s16 }
 0x2ef   :  { %v804_v56 = vpop.permute.xlu1 %803  ;;  %v798_v57 = vpop.permute.xlu0 %797 }
 0x2f0   :  { %v843_v18 = vsel %vm3189_vm0, %v2903_v27, %v798_v57 }
 0x2f3   :  { %v801_v58 = vpop.permute.xlu0 %800  ;;  %v878_v62 = vpop.permute.xlu1 %877 }
 0x2f4   :  { %v845_v19 = vsel %vm3191_vm1, %v843_v18, %v801_v58  ;;  %v922_v13 = vsel %vm3189_vm0, %v2911_v34, %v878_v62  ;;  %vm864_vm0 = vcmask 785408  }
 0x2f5   :  { %v847_v23 = vsel %vm3192_vm2, %v845_v19, %v804_v56 }
 0x2f7   :  { %v807_v63 = vpop.permute.xlu0 %806  ;;  %v881_v1 = vpop.permute.xlu1 %880 }
 0x2f8   :  { %v849_v24 = vsel %vm3193_vm4, %v847_v23, %v807_v63  ;;  %v923_v32 = vsel %vm3191_vm1, %v922_v13, %v881_v1  ;;  %vm3207_vm1 = vcmask 392192  }
 0x2fb   :  { %v810_v2 = vpop.permute.xlu0 %809  ;;  %v884_v5 = vpop.permute.xlu1 %883 }
 0x2fc   :  { %v851_v25 = vsel %vm850_vm5, %v849_v24, %v810_v2  ;;  %v924_v38 = vsel %vm3192_vm2, %v923_v32, %v884_v5  ;;  %vm868_vm2 = vcmask 916480  }
 0x2ff   :  { %v813_v60 = vpop.permute.xlu0 %812  ;;  %v887_v7 = vpop.permute.xlu1 %886 }
 0x300   :  { %v853_v27 = vsel %vm3190_vm6, %v851_v25, %v813_v60  ;;  %v925_v47 = vsel %vm3193_vm4, %v924_v38, %v887_v7  ;;  %vm866_vm6 = vcmask 850944   ;;  %vm3194_vm4 = vcmask 982016  }
 0x303   :  { %v816_v8 = vpop.permute.xlu0 %815  ;;  %v890_v9 = vpop.permute.xlu1 %889 }
 0x304   :  { %v855_v35 = vsel %vm854_vm9, %v853_v27, %v816_v8  ;;  %v926_v34 = vsel %vm850_vm5, %v925_v47, %v890_v9 }
 0x307   :  { %v819_v61 = vpop.permute.xlu0 %818  ;;  %v893_v10 = vpop.permute.xlu1 %892 }
 0x308   :  { %v857_v39 = vsel %vm856_vm10, %v855_v35, %v819_v61  ;;  %v927_v54 = vsel %vm3207_vm1, %v926_v34, %v893_v10 }
 0x30b   :  { %v822_v12 = vpop.permute.xlu0 %821  ;;  %v896_v14 = vpop.permute.xlu1 %895 }
 0x30c   :  { %v859_v48 = vsel %vm858_vm12, %v857_v39, %v822_v12  ;;  %v928_v57 = vsel %vm854_vm9, %v927_v54, %v896_v14 }
 0x30f   :  { %v825_v15 = vpop.permute.xlu0 %824  ;;  %v899_v6 = vpop.permute.xlu1 %898 }
 0x310   :  { %v861_v49 = vsel %vm860_vm13, %v859_v48, %v825_v15  ;;  %v929_v62 = vsel %vm856_vm10, %v928_v57, %v899_v6 }
 0x313   :  { %v828_v16 = vpop.permute.xlu0 %827  ;;  %v902_v17 = vpop.permute.xlu1 %901 }
 0x314   :  { %v863_v56 = vsel %vm862_vm15, %v861_v49, %v828_v16  ;;  %v930_v1 = vsel %vm858_vm12, %v929_v62, %v902_v17  ;;  %v1015_v62 = vld [vmem:[#allocation2 + $0xc] sm:$0xf] }
 0x317   :  { %v831_v20 = vpop.permute.xlu0 %830  ;;  %v905_v22 = vpop.permute.xlu1 %904 }
 0x318   :  { %v865_v58 = vsel %vm864_vm0, %v863_v56, %v831_v20  ;;  %v931_v7 = vsel %vm860_vm13, %v930_v1, %v905_v22 }
 0x31b   :  { %v834_v28 = vpop.permute.xlu0 %833  ;;  %v908_v31 = vpop.permute.xlu1 %907 }
 0x31c   :  { %v867_v63 = vsel %vm866_vm6, %v865_v58, %v834_v28  ;;  %v932_v9 = vsel %vm862_vm15, %v931_v7, %v908_v31 }
 0x31f   :  { %v837_v51 = vpop.permute.xlu0 %836  ;;  %v911_v53 = vpop.permute.xlu1 %910 }
 0x320   :  { %v869_v2 = vsel %vm868_vm2, %v867_v63, %v837_v51  ;;  %v933_v10 = vsel %vm864_vm0, %v932_v9, %v911_v53  ;;  %v1012_v53 = vld [vmem:[#allocation2 + $0x8] sm:$0x1]  ;;  %v1019_v63 = vld [vmem:[#allocation2 + $0x14] sm:$0x1] }
 0x323   :  { %v840_v5 = vpop.permute.xlu0 %839  ;;  %v914_v60 = vpop.permute.xlu1 %913 }
 0x324   :  { %v871_v8 = vsel %vm3194_vm4, %v869_v2, %v840_v5  ;;  %v934_v12 = vsel %vm866_vm6, %v933_v10, %v914_v60 }
 0x325   :  { %v940_v61 = vrot.slane %v871_v8, %v2901_v11 }
 0x327   :  { %v917_v14 = vpop.permute.xlu0 %916  ;;  %v920_v15 = vpop.permute.xlu1 %919  ;;  %v941_v16 = vmul.f32 %v940_v61, %v2863_v43  ;;  %v942_v18 = vmul.f32 %v940_v61, %v2867_v46  ;;  %v943_v19 = vmul.f32 %v2861_v42, %v940_v61  ;;  %v944_v20 = vmul.f32 %v2865_v45, %v940_v61 }
 0x328   :  { %v935_v6 = vsel %vm868_vm2, %v934_v12, %v917_v14 }
 0x329   :  { %v936_v17 = vsel %vm3194_vm4, %v935_v6, %v920_v15 }
 0x32a   :  { %v948_v22 = vrot.slane %v936_v17, %v2901_v11 }
 0x32c   :  { %v949_v23 = vadd.f32 %v948_v22, %v941_v16  ;;  %v950_v24 = vadd.f32 %v948_v22, %v942_v18  ;;  %v951_v25 = vadd.f32 %v948_v22, %v943_v19  ;;  %v952_v13 = vadd.f32 %v948_v22, %v944_v20 }
 0x32e   :  { %v953_v27 = vmax.f32 %v949_v23, 0.0  ;;  %v954_v28 = vmax.f32 %v950_v24, 0.0  ;;  %v955_v31 = vmax.f32 %v951_v25, 0.0  ;;  %v956_v32 = vmax.f32 %v952_v13, 0.0 }
 0x330   :  { %v1894_v35 = vpack.c.bf16 %v953_v27, %v953_v27  ;;  %v1895_v43 = vpack.c.bf16 %v954_v28, %v954_v28  ;;  %v1896_v38 = vpack.c.bf16 %v955_v31, %v955_v31  ;;  %v1897_v39 = vpack.c.bf16 %v956_v32, %v956_v32 }
 0x332   :  { %v970_v47 = vshrl.u32 %v1894_v35, 16  ;;  %v978_v46 = vshrl.u32 %v1895_v43, 16  ;;  %v987_v48 = vshrl.u32 %v1896_v38, 16  ;;  %v995_v42 = vshrl.u32 %v1897_v39, 16 }
 0x333   :  { %v973_v45 = vshll.u32 %v1894_v35, 16  ;;  %v981_v51 = vshll.u32 %v1895_v43, 16  ;;  %v990_v56 = vshll.u32 %v1896_v38, 16  ;;  %v998_v58 = vshll.u32 %v1897_v39, 16 }
 0x334   :  { %v972_v34 = vrot.slane %v970_v47, 7  ;;  %v980_v49 = vrot.slane %v978_v46, 7  ;;  %v989_v54 = vrot.slane %v987_v48, 7  ;;  %v997_v57 = vrot.slane %v995_v42, 7 }
 0x336   :  { %v975_v1 = vor.u32 %v973_v45, %v972_v34  ;;  %v976_v2 = vrot.slane %v972_v34, 4  ;;  %v983_v5 = vor.u32 %v981_v51, %v980_v49  ;;  %v985_v60 = vrot.slane %v980_v49, 4 }
 0x337   :  { %v992_v7 = vor.u32 %v990_v56, %v989_v54  ;;  %v993_v8 = vrot.slane %v989_v54, 4  ;;  %v1000_v9 = vor.u32 %v998_v58, %v997_v57  ;;  %v1002_v61 = vrot.slane %v997_v57, 4 }
 0x338   :  { %v984_v10 = vsel %vm2682_vm7, %v976_v2, %v983_v5  ;;  %v1009_v12 = vsel %vm2688_vm8, %v975_v1, %v2704_v59  ;;  %v1013_v14 = vsel %vm2651_vm3, %v985_v60, %v1012_v53 }
 0x339   :  { %v1001_v15 = vsel %vm2682_vm7, %v993_v8, %v1000_v9  ;;  %1010 = vst [vmem:[#allocation2] sm:$0xf] %v1009_v12  ;;  %1011 = vst [vmem:[#allocation2 + $0x4] sm:$0xf] %v984_v10  ;;  %v1016_v6 = vsel %vm2688_vm8, %v992_v7, %v1015_v62  ;;  %v1020_v16 = vsel %vm2651_vm3, %v1002_v61, %v1019_v63  ;;  %vm3208_vm3 = vmmov 0  }
 0x33a   :  { %1014 = vst [vmem:[#allocation2 + $0x8] sm:$0x1] %v1013_v14  ;;  %1017 = vst [vmem:[#allocation2 + $0xc] sm:$0xf] %v1016_v6  ;;  %vm3209_vm7 = vcmask 64512   ;;  %vm3210_vm8 = vcmask 130048  }
 0x33b   :  { %1018 = vst [vmem:[#allocation2 + $0x10] sm:$0xf] %v1001_v15  ;;  %1021 = vst [vmem:[#allocation2 + $0x14] sm:$0x1] %v1020_v16  ;;  %v2457_v15 = vld [vmem:[#allocation6 + $0x8] sm:$0xff]  }
 0x33c   :  { %vm3213_vm1 = vmmov %vm3209_vm7 }
 0x33d   :  { %vm3215_vm4 = vmmov %vm3210_vm8 }
 0x340   :  { %v1022_v17 = vld [vmem:[#allocation2] sm:$0xf]  ;;  %v2999_v59 = vld [vmem:[#allocation2 + $0x4] sm:$0xf] }
 0x341   :  { %v3001_v18 = vld [vmem:[#allocation2 + $0x8] sm:$0x1]  ;;  %v1045_v19 = vshrl.u32 %v1022_v17, 16  ;;  %v1048_v29 = vshll.u32 %v1022_v17, 16  ;;  %v1054_v20 = vshll.u32 %v2999_v59, 16  ;;  %v1058_v22 = vshrl.u32 %v2999_v59, 16 }
 0x342   :  { %v3005_v23 = vld [vmem:[#allocation2 + $0xc] sm:$0xf]  ;;  %v1064_v36 = vshll.u32 %v3001_v18, 16  ;;  %v3008_v4 = vld [vmem:[#allocation2 + $0x10] sm:$0xf]  ;;  %v1868_v16 = vcombine.low %v1022_v17, %v2999_v59  ;;  %v1331_v17 = vrot.slane %v2999_v59, 5 }
 0x343   :  { %v1069_v24 = vshrl.u32 %v3005_v23, 16  ;;  %v1047_v25 = vrot.slane %v1045_v19, 4  ;;  %v1050_v13 = vrot.slane %v1048_v29, 5  ;;  %v1056_v27 = vrot.slane %v1054_v20, 5  ;;  %v1043_v31 = vld [vmem:[#allocation2 + $0x14] sm:$0x1] }
 0x344   :  { %v1060_v28 = vrot.slane %v1058_v22, 4  ;;  %v1072_v35 = vshll.u32 %v3005_v23, 16  ;;  %v1078_v43 = vshll.u32 %v3008_v4, 16  ;;  %v1082_v47 = vshrl.u32 %v3008_v4, 16  ;;  %v1324_v46 = vld [vmem:[#allocation2 + $0xc] sm:$0xe] }
 0x345   :  { %v1071_v32 = vrot.slane %v1069_v24, 4  ;;  %v1051_v38 = vor.u32 %v1050_v13, %v1047_v25  ;;  %v1066_v48 = vrot.slane %v1064_v36, 5  ;;  %v1088_v53 = vshll.u32 %v1043_v31, 16  ;;  %v2459_v19 = vld [vmem:[#allocation6 + $0x18] sm:$0xff]   ;;  %v2460_v29 = vld [vmem:[#allocation6 + $0x20] sm:$0xff]   ;;  %v2461_v20 = vld [vmem:[#allocation6 + $0x28] sm:$0xff]  }
 0x346   :  { %v1061_v39 = vor.u32 %v1060_v28, %v1056_v27  ;;  %v1074_v42 = vrot.slane %v1072_v35, 5  ;;  %v1080_v34 = vrot.slane %v1078_v43, 5  ;;  %v1084_v51 = vrot.slane %v1082_v47, 4  ;;  %v2462_v22 = vld [vmem:[#allocation6 + $0x30] sm:$0xff]   ;;  %v1323_v36 = vld [vmem:[#allocation2] sm:$0xe] }
 0x347   :  { %v1052_v45 = vrot.slane %v1051_v38, 4  ;;  %v1879_v56 = vrot.slane %v1324_v46, 9  ;;  %v1338_v63 = vrot.slane %v3008_v4, 5  ;;  %v1090_v60 = vrot.slane %v1088_v53, 5  ;;  %v2465_v25 = vld [vmem:[#allocation6 + $0x80] sm:$0xff]   ;;  %v2467_v43 = vld [vmem:[#allocation6 + $0x90] sm:$0xff]  }
 0x348   :  { %v1062_v49 = vrot.slane %v1061_v39, 4  ;;  %v1075_v54 = vor.u32 %v1074_v42, %v1071_v32  ;;  %v1085_v62 = vor.u32 %v1084_v51, %v1080_v34  ;;  %v1341_v8 = vrot.slane %v1043_v31, 5  ;;  %v2466_v32 = vld [vmem:[#allocation6 + $0x88] sm:$0xff]   ;;  %v2469_v38 = vld [vmem:[#allocation6 + $0xa0] sm:$0xff]  }
 0x349   :  { %v1057_v57 = vsel %vm2728_vm11, %v1052_v45, %v1056_v27  ;;  %v1340_v7 = vrot.slane %v1338_v63, 4  ;;  %v3025_v10 = vsel %vm2774_vm14, %v1879_v56, %v1338_v63  ;;  %v1333_v24 = vrot.slane %v1331_v17, 4 }
 0x34a   :  { %v1067_v58 = vsel %vm2728_vm11, %v1062_v49, %v1066_v48  ;;  %v1076_v2 = vrot.slane %v1075_v54, 4  ;;  %v1086_v5 = vrot.slane %v1085_v62, 4  ;;  %v1878_v13 = vrot.slane %v1323_v36, 9 }
 0x34b   :  { %v1858_v1 = vcombine.low %v1057_v57, %v1067_v58  ;;  %v3029_v12 = vsel %vm2774_vm14, %v1340_v7, %v1341_v8  ;;  %v1334_v27 = vrot.slane %v3001_v18, 5  ;;  %v1869_v31 = vcombine.low %v3005_v23, %v3008_v4  ;;  %v2468_v18 = vld [vmem:[#allocation6 + $0x98] sm:$0xff]   ;;  %v2470_v23 = vld [vmem:[#allocation6 + $0xa8] sm:$0xff]  }
 0x34c   :  { %v1081_v9 = vsel %vm2728_vm11, %v1076_v2, %v1080_v34  ;;  %v1091_v61 = vsel %vm2728_vm11, %v1086_v5, %v1090_v60  ;;  %v1881_v6 = vcombine.low %v3025_v10, %v3029_v12  ;;  %v1332_v59 = vsel %vm2774_vm14, %v1878_v13, %v1331_v17  ;;  %v2472_v4 = vld [vmem:[#allocation6 + $0xb8] sm:$0xff]  }
 0x34d   :  { %2172 = vmatprep.mubr.bf16.mxu1 %v1858_v1  ;;  %v1859_v14 = vcombine.low %v1081_v9, %v1091_v61  ;;  %v1335_v28 = vsel %vm2774_vm14, %v1333_v24, %v1334_v27  ;;  %vm3211_vm11 = vcmask 195584   ;;  %vm3212_vm14 = vcmask 261120  }
 0x34e   :  { %v1880_v35 = vcombine.low %v1332_v59, %v1335_v28 }
 0x34f   :  { %2173 = vmatmul.mubr.bf16.vlgmr.msra.gmra.mrb[4].mxu1 %v1859_v14 }
 0x350   :  { %2177 = vmatpush3.bf16.msra.mxu1 %v2945_v55  ;;  %2192 = vmatprep.mubr.bf16.mxu1 %v1868_v16  ;;  %v2463_v55 = vld [vmem:[#allocation6 + $0x38] sm:$0xff]  }
 0x351   :  { %2178 = vmatprep.subr.bf16.mxu1 %v2457_v15 }
 0x354   :  { %2179 = vmatpush3.bf16.msra.mxu1 %v2457_v15 }
 0x355   :  { %2180 = vmatprep.subr.bf16.mxu1 %v2458_v21 }
 0x358   :  { %2181 = vmatpush3.bf16.msra.mxu1 %v2458_v21 }
 0x359   :  { %2182 = vmatprep.subr.bf16.mxu1 %v2459_v19 }
 0x35c   :  { %2183 = vmatpush3.bf16.msra.mxu1 %v2459_v19 }
 0x35d   :  { %2184 = vmatprep.subr.bf16.mxu1 %v2460_v29 }
 0x360   :  { %2185 = vmatpush3.bf16.msra.mxu1 %v2460_v29 }
 0x361   :  { %2186 = vmatprep.subr.bf16.mxu1 %v2461_v20 }
 0x364   :  { %2187 = vmatpush3.bf16.msra.mxu1 %v2461_v20 }
 0x365   :  { %2188 = vmatprep.subr.bf16.mxu1 %v2462_v22 }
 0x368   :  { %2189 = vmatpush3.bf16.msra.mxu1 %v2462_v22 }
 0x369   :  { %2190 = vmatprep.subr.bf16.mxu1 %v2463_v55 }
 0x36c   :  { %2191 = vmatpush3.bf16.msra.mxu1 %v2463_v55 }
 0x36d   :  { %2196 = vmatprep.subr.bf16.mxu1 %v2465_v25 }
 0x36f   :  { %2193 = vmatmul.mubr.bf16.vlgmr.msra.gmra.mrb[4].mxu1 %v1869_v31 }
 0x370   :  { %2197 = vmatpush3.bf16.msra.mxu1 %v2465_v25  ;;  %2212 = vmatprep.mubr.bf16.mxu1 %v1880_v35 }
 0x371   :  { %2198 = vmatprep.subr.bf16.mxu1 %v2466_v32 }
 0x374   :  { %2199 = vmatpush3.bf16.msra.mxu1 %v2466_v32 }
 0x375   :  { %2200 = vmatprep.subr.bf16.mxu1 %v2467_v43 }
 0x378   :  { %2201 = vmatpush3.bf16.msra.mxu1 %v2467_v43 }
 0x379   :  { %2202 = vmatprep.subr.bf16.mxu1 %v2468_v18 }
 0x37c   :  { %2203 = vmatpush3.bf16.msra.mxu1 %v2468_v18 }
 0x37d   :  { %2204 = vmatprep.subr.bf16.mxu1 %v2469_v38 }
 0x380   :  { %2205 = vmatpush3.bf16.msra.mxu1 %v2469_v38 }
 0x381   :  { %2206 = vmatprep.subr.bf16.mxu1 %v2470_v23 }
 0x384   :  { %2207 = vmatpush3.bf16.msra.mxu1 %v2470_v23 }
 0x385   :  { %2208 = vmatprep.subr.bf16.mxu1 %v2471_v3 }
 0x388   :  { %2209 = vmatpush3.bf16.msra.mxu1 %v2471_v3 }
 0x389   :  { %2210 = vmatprep.subr.bf16.mxu1 %v2472_v4 }
 0x38c   :  { %2211 = vmatpush3.bf16.msra.mxu1 %v2472_v4 }
 0x38f   :  { %2213 = vmatmul.mubr.bf16.vlgmr.msra.gmra.mrb[4].mxu1 %v1881_v6 }
 0x462   :  { %v3043_v39 = vpop.f32.mrb[4].mxu1 }
 0x463   :  { %v3045_v47 = vpop.f32.mrb[5].mxu1  ;;  %v1552_v49 = vmul.f32 %v3043_v39, %v3043_v39 }
 0x464   :  { %v3047_v46 = vpop.f32.mrb[6].mxu1  ;;  %v1550_v42 = vmul.f32 %v3045_v47, %v3045_v47 }
 0x465   :  { %v3049_v48 = vpop.f32.mrb[7].mxu1  ;;  %v1553_v54 = vmul.f32 %v3047_v46, %v3047_v46 }
 0x466   :  { %v1471_v34 = vadd.f32 %v3049_v48, %v3045_v47  ;;  %v1551_v45 = vmul.f32 %v3049_v48, %v3049_v48 }
 0x468   :  { %v1472_v51 = vadd.f32 %v3043_v39, %v1471_v34  ;;  %v1554_v53 = vadd.f32 %v1551_v45, %v1550_v42 }
 0x46a   :  { %v1473_v56 = vadd.f32 %v3047_v46, %v1472_v51  ;;  %v1555_v57 = vadd.f32 %v1554_v53, %v1552_v49 }
 0x46c   :  { %v1474_v58 = vrot.slane %v1473_v56, 4  ;;  %v1556_v62 = vadd.f32 %v1555_v57, %v1553_v54 }
 0x46e   :  { %v1475_v63 = vadd.f32 %v1474_v58, %v1473_v56  ;;  %v1557_v7 = vrot.slane %v1556_v62, 4 }
 0x470   :  { %v1476_v1 = vrot.slane %v1475_v63, 2  ;;  %v1558_v8 = vadd.f32 %v1557_v7, %v1556_v62 }
 0x472   :  { %v1477_v2 = vadd.f32 %v1476_v1, %v1475_v63 }
 0x474   :  { %v1478_v5 = vrot.slane %v1477_v2, 1 }
 0x476   :  { %v1479_v60 = vadd.f32 %v1478_v5, %v1477_v2 }
 0x478   :  { %2249 = vmatmul.mubr.f32.vlgmr.msra.gmra.mrb[4].mxu0 %v1479_v60 }
 0x479   :  { %2360 = vmatpush3.bf16.msra.mxu0 %v2750_v44  ;;  %2283 = vmatprep.mubr.msk.f32.mxu0 %vm3208_vm3, %v2559_v40  ;;  %v1559_v44 = vrot.slane %v1558_v8, 2  ;;  %vm3214_vm3 = vcmask 392192  }
 0x47a   :  { %2361 = vmatprep.subr.bf16.mxu0 %v2557_v0 }
 0x47d   :  { %2363 = vmatpush3.bf16.msra.mxu0 %v2763_v50  ;;  %v1560_v50 = vadd.f32 %v1559_v44, %v1558_v8 }
 0x47e   :  { %2364 = vmatprep.subr.bf16.mxu0 %v2557_v0 }
 0x481   :  { %2366 = vmatpush3.bf16.msra.mxu0 %v2767_v52  ;;  %v1561_v52 = vrot.slane %v1560_v50, 1 }
 0x482   :  { %2367 = vmatprep.subr.bf16.mxu0 %v2557_v0 }
 0x485   :  { %2369 = vmatpush3.bf16.msra.mxu0 %v2803_v26  ;;  %v1562_v26 = vadd.f32 %v1561_v52, %v1560_v50 }
 0x486   :  { %2370 = vmatprep.subr.bf16.mxu0 %v2557_v0 }
 0x489   :  { %2372 = vmatpush3.bf16.msra.mxu0 %v2815_v30 }
 0x48a   :  { %2373 = vmatprep.subr.bf16.mxu0 %v2557_v0 }
 0x48d   :  { %2375 = vmatpush3.bf16.msra.mxu0 %v2827_v33 }
 0x48e   :  { %2376 = vmatprep.subr.bf16.mxu0 %v2557_v0 }
 0x491   :  { %2378 = vmatpush3.bf16.msra.mxu0 %v2839_v37  ;;  %v1469_v37 = vld [vmem:[%s3184_s5] sm:$0x1]  ;;  %s2574_s5 = smov [#allocation8]  }
 0x492   :  { %2379 = vmatprep.subr.bf16.mxu0 %v2557_v0 }
 0x495   :  { %2381 = vmatpush3.bf16.msra.mxu0 %v2852_v41  ;;  %v1470_v41 = vld [vmem:[%s3185_s6] sm:$0x1]  ;;  %s1805_s6 = sshll.u32 %s2574_s5, 4  ;;  %s1806_s6 = int_to_ptr.vmem [resolvable:$true] %s1805_s6 }
 0x496   :  { %s2525_s27 = scalar_lea.vmem %s1806_s6, 512  ;;  %p2530_p3 = scmp.lt.s32.totalorder %s1806_s6, %s1806_s6 }
 0x497   :  { %p2526_p2 = scmp.ne.s32.totalorder %s1806_s6, %s2525_s27  ;;  %p2531_p4 = scmp.lt.s32.totalorder %s2525_s27, %s2525_s27 }
 0x498   :  { %2284 = vmatmul.mubr.f32.vlgmr.msra.gmra.mrb[6].mxu0 %v1562_v26 }
 0x499   :  { %p2532_p5 = por %p2531_p4, %p2530_p3 }
 0x49b   :  { %p2533_p6 = pnand %p2532_p5, %p2526_p2 }
 0x54b   :  { %v1546_v40 = vpop.f32.mrb[4].mxu0 }
 0x54c   :  { %v2250_v9 = vpop.f32.mrb[5].mxu0  ;;  %v1633_v30 = vmul.f32 0.001953125, %v1546_v40 }
 0x54e   :  { %v1635_v10 = vmul.f32 %v1633_v30, %v1633_v30 }
 0x56b   :  { %v1629_v61 = vpop.f32.mrb[6].mxu0 }
 0x56c   :  { %v1634_v12 = vmul.f32 0.001953125, %v1629_v61  ;;  %v2285_v14 = vpop.f32.mrb[7].mxu0 }
 0x56e   :  { %v1636_v33 = vsub.f32 %v1634_v12, %v1635_v10 }
 0x570   :  { %v1637_v15 = vadd.f32 1e-05, %v1636_v33 }
 0x572   :  { %2475 = vrsqrt.f32 %v1637_v15 }
 0x57c   :  { %v2476_v0 = vpop.eup %2475 }
 0x57d   :  { %v1639_v6 = vmul.f32 %v2476_v0, %v1469_v37 }
 0x57f   :  { %v1640_v16 = vmul.f32 %v1639_v6, %v1633_v30  ;;  %v1646_v21 = vrot.slane %v1639_v6, %v2901_v11 }
 0x581   :  { %v1641_v19 = vsub.f32 %v1470_v41, %v1640_v16  ;;  %1650 = vrot.lane.b32.xlu1 %v1646_v21, %s2562_s1  ;;  %1647 = vrot.lane.b32.xlu0 %v1646_v21, %s2561_s2 }
 0x583   :  { %v1711_v29 = vrot.slane %v1641_v19, %v2901_v11 }
 0x585   :  { %1653 = vrot.lane.b32.xlu0 %v1646_v21, %s2560_s29  ;;  %1712 = vrot.lane.b32.xlu1 %v1711_v29, %s2561_s2 }
 0x589   :  { %1656 = vrot.lane.b32.xlu0 %v1646_v21, %s2563_s3  ;;  %1715 = vrot.lane.b32.xlu1 %v1711_v29, %s2562_s1 }
 0x58d   :  { %1659 = vrot.lane.b32.xlu0 %v1646_v21, %s2564_s28  ;;  %1718 = vrot.lane.b32.xlu1 %v1711_v29, %s2560_s29 }
 0x591   :  { %1662 = vrot.lane.b32.xlu0 %v1646_v21, %s2565_s4  ;;  %1721 = vrot.lane.b32.xlu1 %v1711_v29, %s2563_s3 }
 0x595   :  { %1665 = vrot.lane.b32.xlu0 %v1646_v21, %s2566_s30  ;;  %1724 = vrot.lane.b32.xlu1 %v1711_v29, %s2564_s28 }
 0x599   :  { %1668 = vrot.lane.b32.xlu0 %v1646_v21, %s2554_s15  ;;  %1727 = vrot.lane.b32.xlu1 %v1711_v29, %s2565_s4 }
 0x59d   :  { %1671 = vrot.lane.b32.xlu0 %v1646_v21, %s2567_s9  ;;  %1730 = vrot.lane.b32.xlu1 %v1711_v29, %s2566_s30 }
 0x5a1   :  { %1674 = vrot.lane.b32.xlu0 %v1646_v21, %s2568_s10  ;;  %1733 = vrot.lane.b32.xlu1 %v1711_v29, %s2554_s15 }
 0x5a5   :  { %1677 = vrot.lane.b32.xlu0 %v1646_v21, %s2569_s11  ;;  %1736 = vrot.lane.b32.xlu1 %v1711_v29, %s2567_s9 }
 0x5a9   :  { %1680 = vrot.lane.b32.xlu0 %v1646_v21, %s2570_s12  ;;  %1739 = vrot.lane.b32.xlu1 %v1711_v29, %s2568_s10 }
 0x5ad   :  { %1683 = vrot.lane.b32.xlu0 %v1646_v21, %s2571_s13  ;;  %1742 = vrot.lane.b32.xlu1 %v1711_v29, %s2569_s11 }
 0x5b1   :  { %1686 = vrot.lane.b32.xlu0 %v1646_v21, %s2572_s14  ;;  %1745 = vrot.lane.b32.xlu1 %v1711_v29, %s2570_s12 }
 0x5b5   :  { %1689 = vrot.lane.b32.xlu0 %v1646_v21, %s2573_s16  ;;  %1748 = vrot.lane.b32.xlu1 %v1711_v29, %s2571_s13 }
 0x5b9   :  { %1751 = vrot.lane.b32.xlu0 %v1711_v29, %s2572_s14  ;;  %1754 = vrot.lane.b32.xlu1 %v1711_v29, %s2573_s16 }
 0x5f3   :  { %v1651_v20 = vpop.permute.xlu1 %1650  ;;  %v1648_v22 = vpop.permute.xlu0 %1647 }
 0x5f4   :  { %v1692_v42 = vsel %vm3209_vm7, %v1639_v6, %v1648_v22  ;;  %vm3216_vm7 = vmmov %vm3211_vm11 }
 0x5f5   :  { %v1693_v34 = vsel %vm3210_vm8, %v1692_v42, %v1651_v20  ;;  %vm3217_vm8 = vmmov %vm3212_vm14 }
 0x5f7   :  { %v1654_v17 = vpop.permute.xlu0 %1653  ;;  %v1713_v55 = vpop.permute.xlu1 %1712 }
 0x5f8   :  { %v1694_v51 = vsel %vm3211_vm11, %v1693_v34, %v1654_v17  ;;  %v1757_v56 = vsel %vm3213_vm1, %v1641_v19, %v1713_v55  ;;  %vm3218_vm11 = vmmov %vm3214_vm3 }
 0x5fb   :  { %v1657_v36 = vpop.permute.xlu0 %1656  ;;  %v1716_v24 = vpop.permute.xlu1 %1715 }
 0x5fc   :  { %v1695_v53 = vsel %vm3212_vm14, %v1694_v51, %v1657_v36  ;;  %v1758_v63 = vsel %vm3215_vm4, %v1757_v56, %v1716_v24  ;;  %vm3219_vm4 = vcmask 982016  }
 0x5ff   :  { %v1660_v25 = vpop.permute.xlu0 %1659  ;;  %v1719_v13 = vpop.permute.xlu1 %1718 }
 0x600   :  { %v1696_v54 = vsel %vm850_vm5, %v1695_v53, %v1660_v25  ;;  %v1759_v2 = vsel %vm3216_vm7, %v1758_v63, %v1719_v13 }
 0x603   :  { %v1663_v27 = vpop.permute.xlu0 %1662  ;;  %v1722_v28 = vpop.permute.xlu1 %1721 }
 0x604   :  { %v1697_v57 = vsel %vm3214_vm3, %v1696_v54, %v1663_v27  ;;  %v1760_v60 = vsel %vm3217_vm8, %v1759_v2, %v1722_v28 }
 0x607   :  { %v1666_v31 = vpop.permute.xlu0 %1665  ;;  %v1725_v59 = vpop.permute.xlu1 %1724 }
 0x608   :  { %v1698_v1 = vsel %vm854_vm9, %v1697_v57, %v1666_v31  ;;  %v1761_v8 = vsel %vm850_vm5, %v1760_v60, %v1725_v59  ;;  %vm3220_vm5 = vmmov %vm3219_vm4 }
 0x60b   :  { %v1669_v32 = vpop.permute.xlu0 %1668  ;;  %v1728_v35 = vpop.permute.xlu1 %1727 }
 0x60c   :  { %v1699_v5 = vsel %vm856_vm10, %v1698_v1, %v1669_v32  ;;  %v1762_v26 = vsel %vm3218_vm11, %v1761_v8, %v1728_v35  ;;  %v2480_v32 = vld [vmem:[%s3179_s0 + $0x18] sm:$0xff] }
 0x60f   :  { %v1672_v43 = vpop.permute.xlu0 %1671  ;;  %v1731_v18 = vpop.permute.xlu1 %1730 }
 0x610   :  { %v1700_v7 = vsel %vm858_vm12, %v1699_v5, %v1672_v43  ;;  %v1763_v9 = vsel %vm854_vm9, %v1762_v26, %v1731_v18 }
 0x613   :  { %v1675_v38 = vpop.permute.xlu0 %1674  ;;  %v1734_v23 = vpop.permute.xlu1 %1733 }
 0x614   :  { %v1701_v44 = vsel %vm860_vm13, %v1700_v7, %v1675_v38  ;;  %v1764_v61 = vsel %vm856_vm10, %v1763_v9, %v1734_v23 }
 0x617   :  { %v1678_v3 = vpop.permute.xlu0 %1677  ;;  %v1737_v4 = vpop.permute.xlu1 %1736 }
 0x618   :  { %v1702_v40 = vsel %vm862_vm15, %v1701_v44, %v1678_v3  ;;  %v1765_v12 = vsel %vm858_vm12, %v1764_v61, %v1737_v4 }
 0x61b   :  { %v1681_v45 = vpop.permute.xlu0 %1680  ;;  %v1740_v49 = vpop.permute.xlu1 %1739 }
 0x61c   :  { %v1703_v30 = vsel %vm864_vm0, %v1702_v40, %v1681_v45  ;;  %v1766_v37 = vsel %vm860_vm13, %v1765_v12, %v1740_v49 }
 0x61f   :  { %v1684_v58 = vpop.permute.xlu0 %1683  ;;  %v1743_v62 = vpop.permute.xlu1 %1742 }
 0x620   :  { %v1704_v10 = vsel %vm866_vm6, %v1703_v30, %v1684_v58  ;;  %v1767_v6 = vsel %vm862_vm15, %v1766_v37, %v1743_v62 }
 0x623   :  { %v1687_v50 = vpop.permute.xlu0 %1686  ;;  %v1746_v52 = vpop.permute.xlu1 %1745 }
 0x624   :  { %v1705_v14 = vsel %vm868_vm2, %v1704_v10, %v1687_v50  ;;  %v1768_v16 = vsel %vm864_vm0, %v1767_v6, %v1746_v52 }
 0x627   :  { %v1690_v33 = vpop.permute.xlu0 %1689  ;;  %v1749_v15 = vpop.permute.xlu1 %1748 }
 0x628   :  { %v1706_v0 = vsel %vm3219_vm4, %v1705_v14, %v1690_v33  ;;  %v1769_v21 = vsel %vm866_vm6, %v1768_v16, %v1749_v15 }
 0x629   :  { %v1775_v41 = vrot.slane %v1706_v0, %v2901_v11 }
 0x62b   :  { %v1752_v19 = vpop.permute.xlu0 %1751  ;;  %v1755_v29 = vpop.permute.xlu1 %1754  ;;  %v1776_v22 = vmul.f32 %v1775_v41, %v3045_v47  ;;  %v1777_v55 = vmul.f32 %v1775_v41, %v3049_v48  ;;  %v1778_v36 = vmul.f32 %v3043_v39, %v1775_v41  ;;  %v1779_v24 = vmul.f32 %v3047_v46, %v1775_v41  ;;  %v2477_v47 = vld [vmem:[%s3179_s0] sm:$0xff]  ;;  %v2478_v48 = vld [vmem:[%s3179_s0 + $0x8] sm:$0xff] }
 0x62c   :  { %v1770_v20 = vsel %vm868_vm2, %v1769_v21, %v1752_v19 }
 0x62d   :  { %v1771_v17 = vsel %vm3220_vm5, %v1770_v20, %v1755_v29 }
 0x62e   :  { %v1783_v25 = vrot.slane %v1771_v17, %v2901_v11  ;;  %v2479_v11 = vld [vmem:[%s3179_s0 + $0x10] sm:$0xff] }
 0x630   :  { %v1784_v13 = vadd.f32 %v1783_v25, %v1776_v22  ;;  %v1785_v27 = vadd.f32 %v1783_v25, %v1777_v55  ;;  %v1786_v28 = vadd.f32 %v1783_v25, %v1778_v36  ;;  %v1787_v31 = vadd.f32 %v1783_v25, %v1779_v24 }
 0x632   :  { %v1788_v59 = vadd.f32 %v2477_v47, %v1784_v13  ;;  %v1789_v39 = vadd.f32 %v2478_v48, %v1785_v27  ;;  %v1790_v46 = vadd.f32 %v2479_v11, %v1786_v28  ;;  %v1791_v35 = vadd.f32 %v2480_v32, %v1787_v31 }
 0x634   :  { %v1792_v43 = vmax.f32 %v1788_v59, 0.0  ;;  %v1793_v18 = vmax.f32 %v1789_v39, 0.0  ;;  %v1794_v38 = vmax.f32 %v1790_v46, 0.0  ;;  %v1795_v23 = vmax.f32 %v1791_v35, 0.0 }
 0x636   :  { %1796 = vst [vmem:[#allocation8] sm:$0xff] %v1792_v43  ;;  %1797 = vst [vmem:[#allocation8 + $0x8] sm:$0xff] %v1793_v18 }
 0x637   :  { %1798 = vst [vmem:[#allocation8 + $0x10] sm:$0xff] %v1794_v38  ;;  %1799 = vst [vmem:[#allocation8 + $0x18] sm:$0xff] %v1795_v23 }
 0x638   :  { %2536 = shalt.err (!%p2533_p6)
}
 0x639   :  { %s2537_s0 = scalar_lea.hbm %s3187_s8, 512 }
 0x63a   :  { %p2538_p7 = scmp.ne.s32.totalorder %s3187_s8, %s2537_s0  ;;  %p2541_p8 = scmp.lt.u32.totalorder %s2537_s0, %s3187_s8 }
 0x63c   :  { %p2543_p9 = pnand %p2541_p8, %p2538_p7 }
 0x63e   :  { %2546 = shalt.err (!%p2543_p9)
}
 0x63f   :  { %s2575_s9 = smov 128  }
 0x640   :  { %1811 = dma.vmem_to_hbm [thread:$0]  %s1806_s6, 512, %s3187_s8, [#allocation5], %s2575_s9, %s2575_s9, %s2561_s2  }
 0x641   :  { %2551 = dma.done.wait [#allocation5], 512  }
 0x642   :  { %2552 = vsyncadd [#allocation5], 4294966784 }
 0x643   :  { %1815 = vsyncpa [#allocation4], 1 }
 0x644   :  { %1816 = vsyncpa [#allocation7], 1 }
 0x645   :  { %1817 = vsyncpa [#allocation5], 1 }

</bundles_post_ra>
